<compile_context>
chip_gen: v7x
topology: tpu7x:2x2x1
jax: 0.10.0
libtpu: 0.0.40
codegen_flags: <defaults>
</compile_context>

<pallas_src>
import math

import jax
import jax.numpy as jnp
from jax.experimental import pallas as pl
from jax.experimental.pallas import tpu as pltpu

# ---- small synthetic BERT config (deterministic, no checkpoint load) --------
B = 2               # batch
S = 8               # sequence length
H = 32              # args.bert_hidden_size
NUM_HEADS = 2
HEAD_DIM = H // NUM_HEADS
INTER = 64          # FFN intermediate size
VOCAB = 128
TYPE_VOCAB = 2
MAX_POS = 64
NUM_LAYERS = 2
DETECT_LABELS = 2        # args.detect_label_num
CORRECT_LABELS = VOCAB   # args.correct_label_num
DETECT_PAD = 128         # lane-dense padding for the detection head
HEADS_OUT = DETECT_PAD + CORRECT_LABELS   # 256, one fused lane-dense output
LN_EPS = 1e-12
N_HVEC = 2 + 6 * NUM_LAYERS   # [emb_g, emb_b] + per layer [ln1_g, ln1_b, ln2_g, ln2_b, bo, b2]


# ----------------------------- shared math helpers ----------------------------
def _layer_norm(x, gamma, beta):
    mean = jnp.mean(x, axis=-1, keepdims=True)
    var = jnp.mean((x - mean) ** 2, axis=-1, keepdims=True)
    return (x - mean) * jax.lax.rsqrt(var + LN_EPS) * gamma + beta


def _gelu(x):
    # TODO(synk): HF BERT default act is erf-based gelu; tanh approximation used here.
    c = math.sqrt(2.0 / math.pi)
    return 0.5 * x * (1.0 + jnp.tanh(c * (x + 0.044715 * x * x * x)))


# ------------------------------ fused Pallas kernel ---------------------------
def fused_forward_kernel(x_ref, mask_ref,
                         wqkv_ref, bqkv_ref, wo_ref,
                         w1_ref, b1_ref, w2_ref,
                         hvec_ref, wh_ref, bh_ref,
                         seq_ref, logits_ref):
    # One grid step = one batch element; all layers; activations stay in vregs/VMEM.
    x = x_ref[0].astype(jnp.float32)                      # (S, H)
    x = _layer_norm(x, hvec_ref[0], hvec_ref[1])          # embedding LayerNorm
    mask = mask_ref[0].astype(jnp.float32)                # (1, S) additive mask (key axis)

    for l in range(NUM_LAYERS):                           # static unroll
        base = 2 + 6 * l

        # ---- self-attention: single fused Q/K/V einsum, head-batched -------
        x_bf = x.astype(jnp.bfloat16)
        x_b = jnp.broadcast_to(x_bf, (3 * NUM_HEADS, S, H))
        qkv = jnp.einsum('hsd,hde->hse', x_b, wqkv_ref[l],
                         preferred_element_type=jnp.float32) + bqkv_ref[l]
        q = qkv[0:NUM_HEADS]                               # (NH, S, DH), scale pre-folded
        k = qkv[NUM_HEADS:2 * NUM_HEADS]
        v = qkv[2 * NUM_HEADS:3 * NUM_HEADS]

        scores = jnp.einsum('hqd,hkd->hqk', q, k,
                            preferred_element_type=jnp.float32) + mask
        m = jnp.max(scores, axis=-1, keepdims=True)
        p = jnp.exp(scores - m)
        p = p * pl.reciprocal(jnp.sum(p, axis=-1, keepdims=True), approx=True)
        ctx = jnp.einsum('hqk,hkd->hqd', p, v,
                         preferred_element_type=jnp.float32)     # (NH, S, DH)

        # output projection: sum_h ctx_h @ Wo_h  ==  concat(ctx) @ Wo
        attn = jnp.sum(
            jnp.einsum('hqd,hdo->hqo', ctx.astype(jnp.bfloat16), wo_ref[l],
                       preferred_element_type=jnp.float32),
            axis=0) + hvec_ref[base + 4]                   # (S, H)

        h1 = _layer_norm(x + attn, hvec_ref[base + 0], hvec_ref[base + 1])

        # ---- feed-forward ----
        ff = _gelu(jnp.dot(h1.astype(jnp.bfloat16), w1_ref[l],
                           preferred_element_type=jnp.float32) + b1_ref[l])
        ff = jnp.dot(ff.astype(jnp.bfloat16), w2_ref[l],
                     preferred_element_type=jnp.float32) + hvec_ref[base + 5]
        x = _layer_norm(h1 + ff, hvec_ref[base + 2], hvec_ref[base + 3])

    # sequence output (self.dropout is identity in eval mode)
    seq_ref[0] = x.astype(seq_ref.dtype)

    # fused detection(+pad to 128) / correction heads -> one lane-dense store
    logits = jnp.dot(x.astype(jnp.bfloat16), wh_ref[...],
                     preferred_element_type=jnp.float32) + bh_ref[...]
    logits_ref[0] = logits.astype(logits_ref.dtype)


# ------------------------------ pallas_call wrapper ---------------------------
def _rep(shape):
    # weight/bias replicated across the batch grid (same block every step ->
    # stays VMEM-resident, not re-DMA'd)
    return pl.BlockSpec(shape, lambda b: (0,) * len(shape))


def fused_forward(emb, mask_add, p):
    inputs = (emb, mask_add,
              p["wqkv"], p["bqkv"], p["wo"],
              p["w1"], p["b1"], p["w2"],
              p["hvec"], p["w_heads"], p["b_heads"])

    in_specs = [
        pl.BlockSpec((1, S, H), lambda b: (b, 0, 0)),             # activations
        pl.BlockSpec((1, 1, S), lambda b: (b, 0, 0)),             # additive mask
        _rep((NUM_LAYERS, 3 * NUM_HEADS, H, HEAD_DIM)),           # fused Wq/Wk/Wv
        _rep((NUM_LAYERS, 3 * NUM_HEADS, 1, HEAD_DIM)),           # fused bq/bk/bv
        _rep((NUM_LAYERS, NUM_HEADS, HEAD_DIM, H)),               # Wo per head
        _rep((NUM_LAYERS, H, INTER)),                             # W1
        _rep((NUM_LAYERS, 1, INTER)),                             # b1
        _rep((NUM_LAYERS, INTER, H)),                             # W2
        _rep((N_HVEC, 1, H)),                                     # packed H-vectors
        _rep((H, HEADS_OUT)),                                     # fused head weights
        _rep((1, HEADS_OUT)),                                     # fused head bias
    ]
    out_specs = (pl.BlockSpec((1, S, H), lambda b: (b, 0, 0)),
                 pl.BlockSpec((1, S, HEADS_OUT), lambda b: (b, 0, 0)))
    out_shape = (jax.ShapeDtypeStruct((B, S, H), jnp.float32),
                 jax.ShapeDtypeStruct((B, S, HEADS_OUT), jnp.float32))

    # Advisory cost estimate so XLA schedules the embedding gathers around us.
    flops = B * (NUM_LAYERS * (8 * S * H * H + 4 * S * S * H + 4 * S * H * INTER)
                 + 2 * S * H * HEADS_OUT)
    transcendentals = B * NUM_LAYERS * (NUM_HEADS * S * S + S * INTER)
    bytes_accessed = (sum(int(a.size) * a.dtype.itemsize for a in inputs)
                      + B * S * (H + HEADS_OUT) * 4)
    cost = pl.CostEstimate(flops=flops, transcendentals=transcendentals,
                           bytes_accessed=bytes_accessed)

    return pl.pallas_call(
        fused_forward_kernel,
        out_shape=out_shape,
        grid=(B,),
        in_specs=in_specs,
        out_specs=out_specs,
        compiler_params=pltpu.CompilerParams(dimension_semantics=("parallel",)),
        cost_estimate=cost,
    )(*inputs)


# ------------------------------ parameter init --------------------------------
def init_canonical_params(key):
    """Canonical (unpacked) weights in standard BERT layouts, for the reference."""
    keys = iter(jax.random.split(key, 128))

    def nrm(shape, s=0.02):
        return jax.random.normal(next(keys), shape, jnp.float32) * s

    def w_bf16(shape, s=0.02):
        # matmul weights rounded to bf16-representable values so the kernel's
        # bf16 weight copies match the f32 reference exactly
        return nrm(shape, s).astype(jnp.bfloat16).astype(jnp.float32)

    def gamma(shape):
        return 1.0 + nrm(shape, 0.1)

    layers = []
    for _ in range(NUM_LAYERS):
        layers.append({
            "wq": w_bf16((H, H)), "bq": nrm((H,)),
            "wk": w_bf16((H, H)), "bk": nrm((H,)),
            "wv": w_bf16((H, H)), "bv": nrm((H,)),
            "wo": w_bf16((H, H)), "bo": nrm((H,)),
            "ln1_g": gamma((H,)), "ln1_b": nrm((H,)),
            "w1": w_bf16((H, INTER)), "b1": nrm((INTER,)),
            "w2": w_bf16((INTER, H)), "b2": nrm((H,)),
            "ln2_g": gamma((H,)), "ln2_b": nrm((H,)),
        })

    return {
        "word_emb": nrm((VOCAB, H)),
        "pos_emb": nrm((MAX_POS, H)),
        "type_emb": nrm((TYPE_VOCAB, H)),
        "emb_ln_g": gamma((H,)), "emb_ln_b": nrm((H,)),
        "layers": layers,
        "det_w": w_bf16((H, DETECT_LABELS)), "det_b": nrm((DETECT_LABELS,)),
        "cor_w": w_bf16((H, CORRECT_LABELS)), "cor_b": nrm((CORRECT_LABELS,)),
    }


def pack_params(c):
    """Pack canonical weights into the kernel layouts (done once, host side)."""
    scale = 1.0 / math.sqrt(HEAD_DIM)   # power of two -> exact in bf16
    wqkv, bqkv, wo, w1, b1, w2 = [], [], [], [], [], []
    hvec_rows = [c["emb_ln_g"], c["emb_ln_b"]]

    for l in range(NUM_LAYERS):
        lw = c["layers"][l]
        per_head_w, per_head_b = [], []
        # head-major packing: row order = [q_h0..q_hN, k_h0..k_hN, v_h0..v_hN]
        for name, s in (("q", scale), ("k", 1.0), ("v", 1.0)):
            wmat = lw["w" + name] * s
            bvec = lw["b" + name] * s
            for h in range(NUM_HEADS):
                per_head_w.append(wmat[:, h * HEAD_DIM:(h + 1) * HEAD_DIM])
                per_head_b.append(bvec[h * HEAD_DIM:(h + 1) * HEAD_DIM])
        wqkv.append(jnp.stack(per_head_w))                       # (3NH, H, DH)
        bqkv.append(jnp.stack(per_head_b)[:, None, :])           # (3NH, 1, DH)
        # wo[l, h] = Wo[h*DH:(h+1)*DH, :]  so  sum_h ctx_h @ wo[l,h] == concat(ctx) @ Wo
        wo.append(jnp.stack([lw["wo"][h * HEAD_DIM:(h + 1) * HEAD_DIM, :]
                             for h in range(NUM_HEADS)]))        # (NH, DH, H)
        w1.append(lw["w1"]); b1.append(lw["b1"][None, :]); w2.append(lw["w2"])
        hvec_rows += [lw["ln1_g"], lw["ln1_b"], lw["ln2_g"], lw["ln2_b"],
                      lw["bo"], lw["b2"]]

    # Fused classifier heads: detection padded 2 -> 128 (zeros), then correction.
    det_w_pad = jnp.zeros((H, DETECT_PAD), jnp.float32).at[:, :DETECT_LABELS].set(c["det_w"])
    w_heads = jnp.concatenate([det_w_pad, c["cor_w"]], axis=1)
    b_heads = jnp.zeros((HEADS_OUT,), jnp.float32)
    b_heads = b_heads.at[:DETECT_LABELS].set(c["det_b"]).at[DETECT_PAD:].set(c["cor_b"])

    return {
        "wqkv": jnp.stack(wqkv).astype(jnp.bfloat16),
        "bqkv": jnp.stack(bqkv),
        "wo": jnp.stack(wo).astype(jnp.bfloat16),
        "w1": jnp.stack(w1).astype(jnp.bfloat16),
        "b1": jnp.stack(b1),
        "w2": jnp.stack(w2).astype(jnp.bfloat16),
        "hvec": jnp.stack(hvec_rows)[:, None, :],                # (N_HVEC, 1, H)
        "w_heads": w_heads.astype(jnp.bfloat16),
        "b_heads": b_heads[None, :],
    }


# ------------------------------ model forward ---------------------------------
def bert_joint_forward(canon, packed, input_ids, attention_mask, token_type_ids):
    # BERT embeddings: word + position + token_type (gather is glue, plain JAX)
    pos_ids = jnp.arange(S)
    emb = (canon["word_emb"][input_ids]
           + canon["pos_emb"][pos_ids][None, :, :]
           + canon["type_emb"][token_type_ids]).astype(jnp.float32)

    # BERT extended attention mask: (1 - mask) * -10000, broadcast over query pos
    mask_add = ((1.0 - attention_mask.astype(jnp.float32)) * -10000.0)[:, None, :]

    sequence_output, logits = fused_forward(emb, mask_add, packed)

    # self.dropout(sequence_output): identity in eval mode (no-op here)
    det_logits = logits[..., :DETECT_LABELS]                            # error_detection
    corr_logits = logits[..., DETECT_PAD:DETECT_PAD + CORRECT_LABELS]   # error_correction
    return sequence_output, det_logits, corr_logits


# ------------------------------ pure-JAX reference -----------------------------
def reference_forward(c, input_ids, attention_mask, token_type_ids):
    pos_ids = jnp.arange(S)
    x = (c["word_emb"][input_ids] + c["pos_emb"][pos_ids][None, :, :]
         + c["type_emb"][token_type_ids]).astype(jnp.float32)
    x = _layer_norm(x, c["emb_ln_g"], c["emb_ln_b"])
    mask = ((1.0 - attention_mask.astype(jnp.float32)) * -10000.0)[:, None, None, :]
    scale = 1.0 / math.sqrt(HEAD_DIM)

    def split(t):   # (B,S,H) -> (B,NH,S,DH)
        return t.reshape(B, S, NUM_HEADS, HEAD_DIM).transpose(0, 2, 1, 3)

    for l in range(NUM_LAYERS):
        lw = c["layers"][l]
        q = split(x @ lw["wq"] + lw["bq"])
        k = split(x @ lw["wk"] + lw["bk"])
        v = split(x @ lw["wv"] + lw["bv"])
        scores = jnp.einsum('bhqd,bhkd->bhqk', q, k) * scale + mask
        p = jax.nn.softmax(scores, axis=-1)
        ctx = jnp.einsum('bhqk,bhkd->bhqd', p, v)
        ctx = ctx.transpose(0, 2, 1, 3).reshape(B, S, H)
        attn = ctx @ lw["wo"] + lw["bo"]
        h1 = _layer_norm(x + attn, lw["ln1_g"], lw["ln1_b"])
        ff = _gelu(h1 @ lw["w1"] + lw["b1"])
        ff = ff @ lw["w2"] + lw["b2"]
        x = _layer_norm(h1 + ff, lw["ln2_g"], lw["ln2_b"])

    det = x @ c["det_w"] + c["det_b"]
    cor = x @ c["cor_w"] + c["cor_b"]
    return x, det, cor


# ----------------------------------- main --------------------------------------
if __name__ == "__main__":
    key = jax.random.PRNGKey(0)
    k_param, k_ids = jax.random.split(key)

    canon = init_canonical_params(k_param)
    packed = pack_params(canon)

    input_ids = jax.random.randint(k_ids, (B, S), 0, VOCAB, dtype=jnp.int32)
    token_type_ids = jnp.zeros((B, S), jnp.int32).at[:, S // 2:].set(1)
    attention_mask = jnp.ones((B, S), jnp.int32).at[1, -2:].set(0)

    seq_out, det_logits, corr_logits = bert_joint_forward(
        canon, packed, input_ids, attention_mask, token_type_ids)
    jax.block_until_ready((seq_out, det_logits, corr_logits))

    assert seq_out.shape == (B, S, H)
    assert det_logits.shape == (B, S, DETECT_LABELS)
    assert corr_logits.shape == (B, S, CORRECT_LABELS)
    assert bool(jnp.all(jnp.isfinite(seq_out)))

    # correctness vs pure-JAX reference (bf16 activation casts -> loose tolerance)
    ref_seq, ref_det, ref_cor = reference_forward(
        canon, input_ids, attention_mask, token_type_ids)
    assert bool(jnp.allclose(seq_out, ref_seq, atol=5e-2, rtol=5e-2))
    assert bool(jnp.allclose(det_logits, ref_det, atol=5e-2, rtol=5e-2))
    assert bool(jnp.allclose(corr_logits, ref_cor, atol=5e-2, rtol=5e-2))

    print("KERNEL_OK")
</pallas_src>

<mosaic_0001>
module attributes {stable_mosaic.version = 11 : i64} {
  func.func @fused_forward_kernel(%arg0: i32, %arg1: memref<1x8x32xf32, #tpu.memory_space<vmem>>, %arg2: memref<1x1x8xf32, #tpu.memory_space<vmem>>, %arg3: memref<2x6x32x16xbf16, #tpu.memory_space<vmem>>, %arg4: memref<2x6x1x16xf32, #tpu.memory_space<vmem>>, %arg5: memref<2x2x16x32xbf16, #tpu.memory_space<vmem>>, %arg6: memref<2x32x64xbf16, #tpu.memory_space<vmem>>, %arg7: memref<2x1x64xf32, #tpu.memory_space<vmem>>, %arg8: memref<2x64x32xbf16, #tpu.memory_space<vmem>>, %arg9: memref<14x1x32xf32, #tpu.memory_space<vmem>>, %arg10: memref<32x256xbf16, #tpu.memory_space<vmem>>, %arg11: memref<1x256xf32, #tpu.memory_space<vmem>>, %arg12: memref<1x8x32xf32, #tpu.memory_space<vmem>>, %arg13: memref<1x8x256xf32, #tpu.memory_space<vmem>>) attributes {dimension_semantics = [#tpu.dimension_semantics<parallel>], iteration_bounds = array<i64: 2>, scalar_prefetch = 0 : i64, scratch_operands = 0 : i64, tpu.core_type = #tpu.core_type<tc>, window_params = [{transform_indices = @transform_0, window_bounds = array<i64: 1, 8, 32>}, {transform_indices = @transform_1, window_bounds = array<i64: 1, 1, 8>}, {pipeline_mode = #tpu.pipeline_mode<synchronous>, transform_indices = @transform_2, window_bounds = array<i64: 2, 6, 32, 16>}, {pipeline_mode = #tpu.pipeline_mode<synchronous>, transform_indices = @transform_3, window_bounds = array<i64: 2, 6, 1, 16>}, {pipeline_mode = #tpu.pipeline_mode<synchronous>, transform_indices = @transform_4, window_bounds = array<i64: 2, 2, 16, 32>}, {pipeline_mode = #tpu.pipeline_mode<synchronous>, transform_indices = @transform_5, window_bounds = array<i64: 2, 32, 64>}, {pipeline_mode = #tpu.pipeline_mode<synchronous>, transform_indices = @transform_6, window_bounds = array<i64: 2, 1, 64>}, {pipeline_mode = #tpu.pipeline_mode<synchronous>, transform_indices = @transform_7, window_bounds = array<i64: 2, 64, 32>}, {pipeline_mode = #tpu.pipeline_mode<synchronous>, transform_indices = @transform_8, window_bounds = array<i64: 14, 1, 32>}, {pipeline_mode = #tpu.pipeline_mode<synchronous>, transform_indices = @transform_9, window_bounds = array<i64: 32, 256>}, {pipeline_mode = #tpu.pipeline_mode<synchronous>, transform_indices = @transform_10, window_bounds = array<i64: 1, 256>}, {transform_indices = @transform_11, window_bounds = array<i64: 1, 8, 32>}, {transform_indices = @transform_12, window_bounds = array<i64: 1, 8, 256>}]} {
    %c0 = arith.constant 0 : index
    %c0_0 = arith.constant 0 : index
    %c0_1 = arith.constant 0 : index
    %0 = vector.load %arg1[%c0, %c0_0, %c0_1] : memref<1x8x32xf32, #tpu.memory_space<vmem>>, vector<1x8x32xf32>
    %1 = vector.shape_cast %0 : vector<1x8x32xf32> to vector<8x32xf32>
    %c0_2 = arith.constant 0 : index
    %c0_3 = arith.constant 0 : index
    %c0_4 = arith.constant 0 : index
    %2 = vector.load %arg9[%c0_2, %c0_3, %c0_4] : memref<14x1x32xf32, #tpu.memory_space<vmem>>, vector<1x1x32xf32>
    %3 = vector.shape_cast %2 : vector<1x1x32xf32> to vector<1x32xf32>
    %c1 = arith.constant 1 : index
    %c0_5 = arith.constant 0 : index
    %c0_6 = arith.constant 0 : index
    %4 = vector.load %arg9[%c1, %c0_5, %c0_6] : memref<14x1x32xf32, #tpu.memory_space<vmem>>, vector<1x1x32xf32>
    %5 = vector.shape_cast %4 : vector<1x1x32xf32> to vector<1x32xf32>
    %cst = arith.constant dense<0.000000e+00> : vector<8xf32>
    %6 = vector.multi_reduction <add>, %1, %cst [1] : vector<8x32xf32> to vector<8xf32>
    %7 = vector.shape_cast %6 : vector<8xf32> to vector<8x1xf32>
    %cst_7 = arith.constant 3.200000e+01 : f32
    %8 = vector.broadcast %cst_7 : f32 to vector<8x1xf32>
    %9 = arith.divf %7, %8 : vector<8x1xf32>
    %10 = vector.broadcast %9 : vector<8x1xf32> to vector<8x32xf32>
    %11 = arith.subf %1, %10 : vector<8x32xf32>
    %12 = arith.mulf %11, %11 : vector<8x32xf32>
    %cst_8 = arith.constant dense<0.000000e+00> : vector<8xf32>
    %13 = vector.multi_reduction <add>, %12, %cst_8 [1] : vector<8x32xf32> to vector<8xf32>
    %14 = vector.shape_cast %13 : vector<8xf32> to vector<8x1xf32>
    %cst_9 = arith.constant 3.200000e+01 : f32
    %15 = vector.broadcast %cst_9 : f32 to vector<8x1xf32>
    %16 = arith.divf %14, %15 : vector<8x1xf32>
    %17 = vector.broadcast %9 : vector<8x1xf32> to vector<8x32xf32>
    %18 = arith.subf %1, %17 : vector<8x32xf32>
    %cst_10 = arith.constant 9.99999996E-13 : f32
    %19 = vector.broadcast %cst_10 : f32 to vector<8x1xf32>
    %20 = arith.addf %16, %19 : vector<8x1xf32>
    %21 = math.rsqrt %20 : vector<8x1xf32>
    %22 = vector.broadcast %21 : vector<8x1xf32> to vector<8x32xf32>
    %23 = arith.mulf %18, %22 : vector<8x32xf32>
    %24 = vector.broadcast %3 : vector<1x32xf32> to vector<8x32xf32>
    %25 = arith.mulf %23, %24 : vector<8x32xf32>
    %26 = vector.broadcast %5 : vector<1x32xf32> to vector<8x32xf32>
    %27 = arith.addf %25, %26 : vector<8x32xf32>
    %c0_11 = arith.constant 0 : index
    %c0_12 = arith.constant 0 : index
    %c0_13 = arith.constant 0 : index
    %28 = vector.load %arg2[%c0_11, %c0_12, %c0_13] : memref<1x1x8xf32, #tpu.memory_space<vmem>>, vector<1x1x8xf32>
    %29 = vector.shape_cast %28 : vector<1x1x8xf32> to vector<1x8xf32>
    %30 = arith.truncf %27 : vector<8x32xf32> to vector<8x32xbf16>
    %31 = vector.shape_cast %30 : vector<8x32xbf16> to vector<1x8x32xbf16>
    %32 = vector.broadcast %31 : vector<1x8x32xbf16> to vector<6x8x32xbf16>
    %c0_14 = arith.constant 0 : index
    %c0_15 = arith.constant 0 : index
    %c0_16 = arith.constant 0 : index
    %c0_17 = arith.constant 0 : index
    %33 = vector.load %arg3[%c0_14, %c0_15, %c0_16, %c0_17] : memref<2x6x32x16xbf16, #tpu.memory_space<vmem>>, vector<1x6x32x16xbf16>
    %34 = vector.shape_cast %33 : vector<1x6x32x16xbf16> to vector<6x32x16xbf16>
    "tpu.trace_start"() <{level = 10 : i32, message = "hsd,hde->hse"}> : () -> ()
    %cst_18 = arith.constant dense<0.000000e+00> : vector<6x8x16xf32>
    %35 = tpu.matmul %32, %34, %cst_18 {dimension_numbers = #tpu.dot_dimension_numbers<[2], [1], [1], [2], [0, 0, 0, 1, 1, 2], [0], [0]>} : vector<6x8x32xbf16>, vector<6x32x16xbf16>, vector<6x8x16xf32> -> vector<6x8x16xf32>
    "tpu.trace_stop"() : () -> ()
    %c0_19 = arith.constant 0 : index
    %c0_20 = arith.constant 0 : index
    %c0_21 = arith.constant 0 : index
    %c0_22 = arith.constant 0 : index
    %36 = vector.load %arg4[%c0_19, %c0_20, %c0_21, %c0_22] : memref<2x6x1x16xf32, #tpu.memory_space<vmem>>, vector<1x6x1x16xf32>
    %37 = vector.shape_cast %36 : vector<1x6x1x16xf32> to vector<6x1x16xf32>
    %38 = vector.broadcast %37 : vector<6x1x16xf32> to vector<6x8x16xf32>
    %39 = arith.addf %35, %38 : vector<6x8x16xf32>
    %40 = vector.extract_strided_slice %39 {offsets = [0, 0, 0], sizes = [2, 8, 16], strides = [1, 1, 1]} : vector<6x8x16xf32> to vector<2x8x16xf32>
    %41 = vector.extract_strided_slice %39 {offsets = [2, 0, 0], sizes = [2, 8, 16], strides = [1, 1, 1]} : vector<6x8x16xf32> to vector<2x8x16xf32>
    %42 = vector.extract_strided_slice %39 {offsets = [4, 0, 0], sizes = [2, 8, 16], strides = [1, 1, 1]} : vector<6x8x16xf32> to vector<2x8x16xf32>
    "tpu.trace_start"() <{level = 10 : i32, message = "hqd,hkd->hqk"}> : () -> ()
    %cst_23 = arith.constant dense<0.000000e+00> : vector<2x8x8xf32>
    %43 = tpu.matmul %40, %41, %cst_23 {dimension_numbers = #tpu.dot_dimension_numbers<[2], [2], [1], [1], [0, 0, 0, 1, 1, 1], [0], [0]>} : vector<2x8x16xf32>, vector<2x8x16xf32>, vector<2x8x8xf32> -> vector<2x8x8xf32>
    "tpu.trace_stop"() : () -> ()
    %44 = vector.shape_cast %29 : vector<1x8xf32> to vector<1x1x8xf32>
    %45 = vector.broadcast %44 : vector<1x1x8xf32> to vector<2x8x8xf32>
    %46 = arith.addf %43, %45 : vector<2x8x8xf32>
    %cst_24 = arith.constant dense<0xFF800000> : vector<2x8xf32>
    %47 = vector.multi_reduction <maximumf>, %46, %cst_24 [2] : vector<2x8x8xf32> to vector<2x8xf32>
    %48 = vector.shape_cast %47 : vector<2x8xf32> to vector<2x8x1xf32>
    %49 = vector.broadcast %48 : vector<2x8x1xf32> to vector<2x8x8xf32>
    %50 = arith.subf %46, %49 : vector<2x8x8xf32>
    %51 = math.exp %50 : vector<2x8x8xf32>
    %cst_25 = arith.constant dense<0.000000e+00> : vector<2x8xf32>
    %52 = vector.multi_reduction <add>, %51, %cst_25 [2] : vector<2x8x8xf32> to vector<2x8xf32>
    %53 = vector.shape_cast %52 : vector<2x8xf32> to vector<2x8x1xf32>
    %54 = tpu.reciprocal %53 {approx = true} : vector<2x8x1xf32> -> vector<2x8x1xf32>
    %55 = vector.broadcast %54 : vector<2x8x1xf32> to vector<2x8x8xf32>
    %56 = arith.mulf %51, %55 : vector<2x8x8xf32>
    "tpu.trace_start"() <{level = 10 : i32, message = "hqk,hkd->hqd"}> : () -> ()
    %cst_26 = arith.constant dense<0.000000e+00> : vector<2x8x16xf32>
    %57 = tpu.matmul %56, %42, %cst_26 {dimension_numbers = #tpu.dot_dimension_numbers<[2], [1], [1], [2], [0, 0, 0, 1, 1, 2], [0], [0]>} : vector<2x8x8xf32>, vector<2x8x16xf32>, vector<2x8x16xf32> -> vector<2x8x16xf32>
    "tpu.trace_stop"() : () -> ()
    %58 = arith.truncf %57 : vector<2x8x16xf32> to vector<2x8x16xbf16>
    %c0_27 = arith.constant 0 : index
    %c0_28 = arith.constant 0 : index
    %c0_29 = arith.constant 0 : index
    %c0_30 = arith.constant 0 : index
    %59 = vector.load %arg5[%c0_27, %c0_28, %c0_29, %c0_30] : memref<2x2x16x32xbf16, #tpu.memory_space<vmem>>, vector<1x2x16x32xbf16>
    %60 = vector.shape_cast %59 : vector<1x2x16x32xbf16> to vector<2x16x32xbf16>
    "tpu.trace_start"() <{level = 10 : i32, message = "hqd,hdo->hqo"}> : () -> ()
    %cst_31 = arith.constant dense<0.000000e+00> : vector<2x8x32xf32>
    %61 = tpu.matmul %58, %60, %cst_31 {dimension_numbers = #tpu.dot_dimension_numbers<[2], [1], [1], [2], [0, 0, 0, 1, 1, 2], [0], [0]>} : vector<2x8x16xbf16>, vector<2x16x32xbf16>, vector<2x8x32xf32> -> vector<2x8x32xf32>
    "tpu.trace_stop"() : () -> ()
    %cst_32 = arith.constant dense<0.000000e+00> : vector<8x32xf32>
    %62 = vector.multi_reduction <add>, %61, %cst_32 [0] : vector<2x8x32xf32> to vector<8x32xf32>
    %c6 = arith.constant 6 : index
    %c0_33 = arith.constant 0 : index
    %c0_34 = arith.constant 0 : index
    %63 = vector.load %arg9[%c6, %c0_33, %c0_34] : memref<14x1x32xf32, #tpu.memory_space<vmem>>, vector<1x1x32xf32>
    %64 = vector.shape_cast %63 : vector<1x1x32xf32> to vector<1x32xf32>
    %65 = vector.broadcast %64 : vector<1x32xf32> to vector<8x32xf32>
    %66 = arith.addf %62, %65 : vector<8x32xf32>
    %67 = arith.addf %27, %66 : vector<8x32xf32>
    %c2 = arith.constant 2 : index
    %c0_35 = arith.constant 0 : index
    %c0_36 = arith.constant 0 : index
    %68 = vector.load %arg9[%c2, %c0_35, %c0_36] : memref<14x1x32xf32, #tpu.memory_space<vmem>>, vector<1x1x32xf32>
    %69 = vector.shape_cast %68 : vector<1x1x32xf32> to vector<1x32xf32>
    %c3 = arith.constant 3 : index
    %c0_37 = arith.constant 0 : index
    %c0_38 = arith.constant 0 : index
    %70 = vector.load %arg9[%c3, %c0_37, %c0_38] : memref<14x1x32xf32, #tpu.memory_space<vmem>>, vector<1x1x32xf32>
    %71 = vector.shape_cast %70 : vector<1x1x32xf32> to vector<1x32xf32>
    %cst_39 = arith.constant dense<0.000000e+00> : vector<8xf32>
    %72 = vector.multi_reduction <add>, %67, %cst_39 [1] : vector<8x32xf32> to vector<8xf32>
    %73 = vector.shape_cast %72 : vector<8xf32> to vector<8x1xf32>
    %cst_40 = arith.constant 3.200000e+01 : f32
    %74 = vector.broadcast %cst_40 : f32 to vector<8x1xf32>
    %75 = arith.divf %73, %74 : vector<8x1xf32>
    %76 = vector.broadcast %75 : vector<8x1xf32> to vector<8x32xf32>
    %77 = arith.subf %67, %76 : vector<8x32xf32>
    %78 = arith.mulf %77, %77 : vector<8x32xf32>
    %cst_41 = arith.constant dense<0.000000e+00> : vector<8xf32>
    %79 = vector.multi_reduction <add>, %78, %cst_41 [1] : vector<8x32xf32> to vector<8xf32>
    %80 = vector.shape_cast %79 : vector<8xf32> to vector<8x1xf32>
    %cst_42 = arith.constant 3.200000e+01 : f32
    %81 = vector.broadcast %cst_42 : f32 to vector<8x1xf32>
    %82 = arith.divf %80, %81 : vector<8x1xf32>
    %83 = vector.broadcast %75 : vector<8x1xf32> to vector<8x32xf32>
    %84 = arith.subf %67, %83 : vector<8x32xf32>
    %cst_43 = arith.constant 9.99999996E-13 : f32
    %85 = vector.broadcast %cst_43 : f32 to vector<8x1xf32>
    %86 = arith.addf %82, %85 : vector<8x1xf32>
    %87 = math.rsqrt %86 : vector<8x1xf32>
    %88 = vector.broadcast %87 : vector<8x1xf32> to vector<8x32xf32>
    %89 = arith.mulf %84, %88 : vector<8x32xf32>
    %90 = vector.broadcast %69 : vector<1x32xf32> to vector<8x32xf32>
    %91 = arith.mulf %89, %90 : vector<8x32xf32>
    %92 = vector.broadcast %71 : vector<1x32xf32> to vector<8x32xf32>
    %93 = arith.addf %91, %92 : vector<8x32xf32>
    %94 = arith.truncf %93 : vector<8x32xf32> to vector<8x32xbf16>
    %c0_44 = arith.constant 0 : index
    %c0_45 = arith.constant 0 : index
    %c0_46 = arith.constant 0 : index
    %95 = vector.load %arg6[%c0_44, %c0_45, %c0_46] : memref<2x32x64xbf16, #tpu.memory_space<vmem>>, vector<1x32x64xbf16>
    %96 = vector.shape_cast %95 : vector<1x32x64xbf16> to vector<32x64xbf16>
    %cst_47 = arith.constant dense<0.000000e+00> : vector<8x64xf32>
    %97 = tpu.matmul %94, %96, %cst_47 {dimension_numbers = #tpu.dot_dimension_numbers<[1], [0], [0], [1], [0, 0, 1, 1], [], []>} : vector<8x32xbf16>, vector<32x64xbf16>, vector<8x64xf32> -> vector<8x64xf32>
    %c0_48 = arith.constant 0 : index
    %c0_49 = arith.constant 0 : index
    %c0_50 = arith.constant 0 : index
    %98 = vector.load %arg7[%c0_48, %c0_49, %c0_50] : memref<2x1x64xf32, #tpu.memory_space<vmem>>, vector<1x1x64xf32>
    %99 = vector.shape_cast %98 : vector<1x1x64xf32> to vector<1x64xf32>
    %100 = vector.broadcast %99 : vector<1x64xf32> to vector<8x64xf32>
    %101 = arith.addf %97, %100 : vector<8x64xf32>
    %cst_51 = arith.constant 5.000000e-01 : f32
    %102 = vector.broadcast %cst_51 : f32 to vector<8x64xf32>
    %103 = arith.mulf %102, %101 : vector<8x64xf32>
    %cst_52 = arith.constant 4.471500e-02 : f32
    %104 = vector.broadcast %cst_52 : f32 to vector<8x64xf32>
    %105 = arith.mulf %104, %101 : vector<8x64xf32>
    %106 = arith.mulf %105, %101 : vector<8x64xf32>
    %107 = arith.mulf %106, %101 : vector<8x64xf32>
    %108 = arith.addf %101, %107 : vector<8x64xf32>
    %cst_53 = arith.constant 0.797884583 : f32
    %109 = vector.broadcast %cst_53 : f32 to vector<8x64xf32>
    %110 = arith.mulf %109, %108 : vector<8x64xf32>
    %111 = math.tanh %110 : vector<8x64xf32>
    %cst_54 = arith.constant 1.000000e+00 : f32
    %112 = vector.broadcast %cst_54 : f32 to vector<8x64xf32>
    %113 = arith.addf %112, %111 : vector<8x64xf32>
    %114 = arith.mulf %103, %113 : vector<8x64xf32>
    %115 = arith.truncf %114 : vector<8x64xf32> to vector<8x64xbf16>
    %c0_55 = arith.constant 0 : index
    %c0_56 = arith.constant 0 : index
    %c0_57 = arith.constant 0 : index
    %116 = vector.load %arg8[%c0_55, %c0_56, %c0_57] : memref<2x64x32xbf16, #tpu.memory_space<vmem>>, vector<1x64x32xbf16>
    %117 = vector.shape_cast %116 : vector<1x64x32xbf16> to vector<64x32xbf16>
    %cst_58 = arith.constant dense<0.000000e+00> : vector<8x32xf32>
    %118 = tpu.matmul %115, %117, %cst_58 {dimension_numbers = #tpu.dot_dimension_numbers<[1], [0], [0], [1], [0, 0, 1, 1], [], []>} : vector<8x64xbf16>, vector<64x32xbf16>, vector<8x32xf32> -> vector<8x32xf32>
    %c7 = arith.constant 7 : index
    %c0_59 = arith.constant 0 : index
    %c0_60 = arith.constant 0 : index
    %119 = vector.load %arg9[%c7, %c0_59, %c0_60] : memref<14x1x32xf32, #tpu.memory_space<vmem>>, vector<1x1x32xf32>
    %120 = vector.shape_cast %119 : vector<1x1x32xf32> to vector<1x32xf32>
    %121 = vector.broadcast %120 : vector<1x32xf32> to vector<8x32xf32>
    %122 = arith.addf %118, %121 : vector<8x32xf32>
    %123 = arith.addf %93, %122 : vector<8x32xf32>
    %c4 = arith.constant 4 : index
    %c0_61 = arith.constant 0 : index
    %c0_62 = arith.constant 0 : index
    %124 = vector.load %arg9[%c4, %c0_61, %c0_62] : memref<14x1x32xf32, #tpu.memory_space<vmem>>, vector<1x1x32xf32>
    %125 = vector.shape_cast %124 : vector<1x1x32xf32> to vector<1x32xf32>
    %c5 = arith.constant 5 : index
    %c0_63 = arith.constant 0 : index
    %c0_64 = arith.constant 0 : index
    %126 = vector.load %arg9[%c5, %c0_63, %c0_64] : memref<14x1x32xf32, #tpu.memory_space<vmem>>, vector<1x1x32xf32>
    %127 = vector.shape_cast %126 : vector<1x1x32xf32> to vector<1x32xf32>
    %cst_65 = arith.constant dense<0.000000e+00> : vector<8xf32>
    %128 = vector.multi_reduction <add>, %123, %cst_65 [1] : vector<8x32xf32> to vector<8xf32>
    %129 = vector.shape_cast %128 : vector<8xf32> to vector<8x1xf32>
    %cst_66 = arith.constant 3.200000e+01 : f32
    %130 = vector.broadcast %cst_66 : f32 to vector<8x1xf32>
    %131 = arith.divf %129, %130 : vector<8x1xf32>
    %132 = vector.broadcast %131 : vector<8x1xf32> to vector<8x32xf32>
    %133 = arith.subf %123, %132 : vector<8x32xf32>
    %134 = arith.mulf %133, %133 : vector<8x32xf32>
    %cst_67 = arith.constant dense<0.000000e+00> : vector<8xf32>
    %135 = vector.multi_reduction <add>, %134, %cst_67 [1] : vector<8x32xf32> to vector<8xf32>
    %136 = vector.shape_cast %135 : vector<8xf32> to vector<8x1xf32>
    %cst_68 = arith.constant 3.200000e+01 : f32
    %137 = vector.broadcast %cst_68 : f32 to vector<8x1xf32>
    %138 = arith.divf %136, %137 : vector<8x1xf32>
    %139 = vector.broadcast %131 : vector<8x1xf32> to vector<8x32xf32>
    %140 = arith.subf %123, %139 : vector<8x32xf32>
    %cst_69 = arith.constant 9.99999996E-13 : f32
    %141 = vector.broadcast %cst_69 : f32 to vector<8x1xf32>
    %142 = arith.addf %138, %141 : vector<8x1xf32>
    %143 = math.rsqrt %142 : vector<8x1xf32>
    %144 = vector.broadcast %143 : vector<8x1xf32> to vector<8x32xf32>
    %145 = arith.mulf %140, %144 : vector<8x32xf32>
    %146 = vector.broadcast %125 : vector<1x32xf32> to vector<8x32xf32>
    %147 = arith.mulf %145, %146 : vector<8x32xf32>
    %148 = vector.broadcast %127 : vector<1x32xf32> to vector<8x32xf32>
    %149 = arith.addf %147, %148 : vector<8x32xf32>
    %150 = arith.truncf %149 : vector<8x32xf32> to vector<8x32xbf16>
    %151 = vector.shape_cast %150 : vector<8x32xbf16> to vector<1x8x32xbf16>
    %152 = vector.broadcast %151 : vector<1x8x32xbf16> to vector<6x8x32xbf16>
    %c1_70 = arith.constant 1 : index
    %c0_71 = arith.constant 0 : index
    %c0_72 = arith.constant 0 : index
    %c0_73 = arith.constant 0 : index
    %153 = vector.load %arg3[%c1_70, %c0_71, %c0_72, %c0_73] : memref<2x6x32x16xbf16, #tpu.memory_space<vmem>>, vector<1x6x32x16xbf16>
    %154 = vector.shape_cast %153 : vector<1x6x32x16xbf16> to vector<6x32x16xbf16>
    "tpu.trace_start"() <{level = 10 : i32, message = "hsd,hde->hse"}> : () -> ()
    %cst_74 = arith.constant dense<0.000000e+00> : vector<6x8x16xf32>
    %155 = tpu.matmul %152, %154, %cst_74 {dimension_numbers = #tpu.dot_dimension_numbers<[2], [1], [1], [2], [0, 0, 0, 1, 1, 2], [0], [0]>} : vector<6x8x32xbf16>, vector<6x32x16xbf16>, vector<6x8x16xf32> -> vector<6x8x16xf32>
    "tpu.trace_stop"() : () -> ()
    %c1_75 = arith.constant 1 : index
    %c0_76 = arith.constant 0 : index
    %c0_77 = arith.constant 0 : index
    %c0_78 = arith.constant 0 : index
    %156 = vector.load %arg4[%c1_75, %c0_76, %c0_77, %c0_78] : memref<2x6x1x16xf32, #tpu.memory_space<vmem>>, vector<1x6x1x16xf32>
    %157 = vector.shape_cast %156 : vector<1x6x1x16xf32> to vector<6x1x16xf32>
    %158 = vector.broadcast %157 : vector<6x1x16xf32> to vector<6x8x16xf32>
    %159 = arith.addf %155, %158 : vector<6x8x16xf32>
    %160 = vector.extract_strided_slice %159 {offsets = [0, 0, 0], sizes = [2, 8, 16], strides = [1, 1, 1]} : vector<6x8x16xf32> to vector<2x8x16xf32>
    %161 = vector.extract_strided_slice %159 {offsets = [2, 0, 0], sizes = [2, 8, 16], strides = [1, 1, 1]} : vector<6x8x16xf32> to vector<2x8x16xf32>
    %162 = vector.extract_strided_slice %159 {offsets = [4, 0, 0], sizes = [2, 8, 16], strides = [1, 1, 1]} : vector<6x8x16xf32> to vector<2x8x16xf32>
    "tpu.trace_start"() <{level = 10 : i32, message = "hqd,hkd->hqk"}> : () -> ()
    %cst_79 = arith.constant dense<0.000000e+00> : vector<2x8x8xf32>
    %163 = tpu.matmul %160, %161, %cst_79 {dimension_numbers = #tpu.dot_dimension_numbers<[2], [2], [1], [1], [0, 0, 0, 1, 1, 1], [0], [0]>} : vector<2x8x16xf32>, vector<2x8x16xf32>, vector<2x8x8xf32> -> vector<2x8x8xf32>
    "tpu.trace_stop"() : () -> ()
    %164 = vector.shape_cast %29 : vector<1x8xf32> to vector<1x1x8xf32>
    %165 = vector.broadcast %164 : vector<1x1x8xf32> to vector<2x8x8xf32>
    %166 = arith.addf %163, %165 : vector<2x8x8xf32>
    %cst_80 = arith.constant dense<0xFF800000> : vector<2x8xf32>
    %167 = vector.multi_reduction <maximumf>, %166, %cst_80 [2] : vector<2x8x8xf32> to vector<2x8xf32>
    %168 = vector.shape_cast %167 : vector<2x8xf32> to vector<2x8x1xf32>
    %169 = vector.broadcast %168 : vector<2x8x1xf32> to vector<2x8x8xf32>
    %170 = arith.subf %166, %169 : vector<2x8x8xf32>
    %171 = math.exp %170 : vector<2x8x8xf32>
    %cst_81 = arith.constant dense<0.000000e+00> : vector<2x8xf32>
    %172 = vector.multi_reduction <add>, %171, %cst_81 [2] : vector<2x8x8xf32> to vector<2x8xf32>
    %173 = vector.shape_cast %172 : vector<2x8xf32> to vector<2x8x1xf32>
    %174 = tpu.reciprocal %173 {approx = true} : vector<2x8x1xf32> -> vector<2x8x1xf32>
    %175 = vector.broadcast %174 : vector<2x8x1xf32> to vector<2x8x8xf32>
    %176 = arith.mulf %171, %175 : vector<2x8x8xf32>
    "tpu.trace_start"() <{level = 10 : i32, message = "hqk,hkd->hqd"}> : () -> ()
    %cst_82 = arith.constant dense<0.000000e+00> : vector<2x8x16xf32>
    %177 = tpu.matmul %176, %162, %cst_82 {dimension_numbers = #tpu.dot_dimension_numbers<[2], [1], [1], [2], [0, 0, 0, 1, 1, 2], [0], [0]>} : vector<2x8x8xf32>, vector<2x8x16xf32>, vector<2x8x16xf32> -> vector<2x8x16xf32>
    "tpu.trace_stop"() : () -> ()
    %178 = arith.truncf %177 : vector<2x8x16xf32> to vector<2x8x16xbf16>
    %c1_83 = arith.constant 1 : index
    %c0_84 = arith.constant 0 : index
    %c0_85 = arith.constant 0 : index
    %c0_86 = arith.constant 0 : index
    %179 = vector.load %arg5[%c1_83, %c0_84, %c0_85, %c0_86] : memref<2x2x16x32xbf16, #tpu.memory_space<vmem>>, vector<1x2x16x32xbf16>
    %180 = vector.shape_cast %179 : vector<1x2x16x32xbf16> to vector<2x16x32xbf16>
    "tpu.trace_start"() <{level = 10 : i32, message = "hqd,hdo->hqo"}> : () -> ()
    %cst_87 = arith.constant dense<0.000000e+00> : vector<2x8x32xf32>
    %181 = tpu.matmul %178, %180, %cst_87 {dimension_numbers = #tpu.dot_dimension_numbers<[2], [1], [1], [2], [0, 0, 0, 1, 1, 2], [0], [0]>} : vector<2x8x16xbf16>, vector<2x16x32xbf16>, vector<2x8x32xf32> -> vector<2x8x32xf32>
    "tpu.trace_stop"() : () -> ()
    %cst_88 = arith.constant dense<0.000000e+00> : vector<8x32xf32>
    %182 = vector.multi_reduction <add>, %181, %cst_88 [0] : vector<2x8x32xf32> to vector<8x32xf32>
    %c12 = arith.constant 12 : index
    %c0_89 = arith.constant 0 : index
    %c0_90 = arith.constant 0 : index
    %183 = vector.load %arg9[%c12, %c0_89, %c0_90] : memref<14x1x32xf32, #tpu.memory_space<vmem>>, vector<1x1x32xf32>
    %184 = vector.shape_cast %183 : vector<1x1x32xf32> to vector<1x32xf32>
    %185 = vector.broadcast %184 : vector<1x32xf32> to vector<8x32xf32>
    %186 = arith.addf %182, %185 : vector<8x32xf32>
    %187 = arith.addf %149, %186 : vector<8x32xf32>
    %c8 = arith.constant 8 : index
    %c0_91 = arith.constant 0 : index
    %c0_92 = arith.constant 0 : index
    %188 = vector.load %arg9[%c8, %c0_91, %c0_92] : memref<14x1x32xf32, #tpu.memory_space<vmem>>, vector<1x1x32xf32>
    %189 = vector.shape_cast %188 : vector<1x1x32xf32> to vector<1x32xf32>
    %c9 = arith.constant 9 : index
    %c0_93 = arith.constant 0 : index
    %c0_94 = arith.constant 0 : index
    %190 = vector.load %arg9[%c9, %c0_93, %c0_94] : memref<14x1x32xf32, #tpu.memory_space<vmem>>, vector<1x1x32xf32>
    %191 = vector.shape_cast %190 : vector<1x1x32xf32> to vector<1x32xf32>
    %cst_95 = arith.constant dense<0.000000e+00> : vector<8xf32>
    %192 = vector.multi_reduction <add>, %187, %cst_95 [1] : vector<8x32xf32> to vector<8xf32>
    %193 = vector.shape_cast %192 : vector<8xf32> to vector<8x1xf32>
    %cst_96 = arith.constant 3.200000e+01 : f32
    %194 = vector.broadcast %cst_96 : f32 to vector<8x1xf32>
    %195 = arith.divf %193, %194 : vector<8x1xf32>
    %196 = vector.broadcast %195 : vector<8x1xf32> to vector<8x32xf32>
    %197 = arith.subf %187, %196 : vector<8x32xf32>
    %198 = arith.mulf %197, %197 : vector<8x32xf32>
    %cst_97 = arith.constant dense<0.000000e+00> : vector<8xf32>
    %199 = vector.multi_reduction <add>, %198, %cst_97 [1] : vector<8x32xf32> to vector<8xf32>
    %200 = vector.shape_cast %199 : vector<8xf32> to vector<8x1xf32>
    %cst_98 = arith.constant 3.200000e+01 : f32
    %201 = vector.broadcast %cst_98 : f32 to vector<8x1xf32>
    %202 = arith.divf %200, %201 : vector<8x1xf32>
    %203 = vector.broadcast %195 : vector<8x1xf32> to vector<8x32xf32>
    %204 = arith.subf %187, %203 : vector<8x32xf32>
    %cst_99 = arith.constant 9.99999996E-13 : f32
    %205 = vector.broadcast %cst_99 : f32 to vector<8x1xf32>
    %206 = arith.addf %202, %205 : vector<8x1xf32>
    %207 = math.rsqrt %206 : vector<8x1xf32>
    %208 = vector.broadcast %207 : vector<8x1xf32> to vector<8x32xf32>
    %209 = arith.mulf %204, %208 : vector<8x32xf32>
    %210 = vector.broadcast %189 : vector<1x32xf32> to vector<8x32xf32>
    %211 = arith.mulf %209, %210 : vector<8x32xf32>
    %212 = vector.broadcast %191 : vector<1x32xf32> to vector<8x32xf32>
    %213 = arith.addf %211, %212 : vector<8x32xf32>
    %214 = arith.truncf %213 : vector<8x32xf32> to vector<8x32xbf16>
    %c1_100 = arith.constant 1 : index
    %c0_101 = arith.constant 0 : index
    %c0_102 = arith.constant 0 : index
    %215 = vector.load %arg6[%c1_100, %c0_101, %c0_102] : memref<2x32x64xbf16, #tpu.memory_space<vmem>>, vector<1x32x64xbf16>
    %216 = vector.shape_cast %215 : vector<1x32x64xbf16> to vector<32x64xbf16>
    %cst_103 = arith.constant dense<0.000000e+00> : vector<8x64xf32>
    %217 = tpu.matmul %214, %216, %cst_103 {dimension_numbers = #tpu.dot_dimension_numbers<[1], [0], [0], [1], [0, 0, 1, 1], [], []>} : vector<8x32xbf16>, vector<32x64xbf16>, vector<8x64xf32> -> vector<8x64xf32>
    %c1_104 = arith.constant 1 : index
    %c0_105 = arith.constant 0 : index
    %c0_106 = arith.constant 0 : index
    %218 = vector.load %arg7[%c1_104, %c0_105, %c0_106] : memref<2x1x64xf32, #tpu.memory_space<vmem>>, vector<1x1x64xf32>
    %219 = vector.shape_cast %218 : vector<1x1x64xf32> to vector<1x64xf32>
    %220 = vector.broadcast %219 : vector<1x64xf32> to vector<8x64xf32>
    %221 = arith.addf %217, %220 : vector<8x64xf32>
    %cst_107 = arith.constant 5.000000e-01 : f32
    %222 = vector.broadcast %cst_107 : f32 to vector<8x64xf32>
    %223 = arith.mulf %222, %221 : vector<8x64xf32>
    %cst_108 = arith.constant 4.471500e-02 : f32
    %224 = vector.broadcast %cst_108 : f32 to vector<8x64xf32>
    %225 = arith.mulf %224, %221 : vector<8x64xf32>
    %226 = arith.mulf %225, %221 : vector<8x64xf32>
    %227 = arith.mulf %226, %221 : vector<8x64xf32>
    %228 = arith.addf %221, %227 : vector<8x64xf32>
    %cst_109 = arith.constant 0.797884583 : f32
    %229 = vector.broadcast %cst_109 : f32 to vector<8x64xf32>
    %230 = arith.mulf %229, %228 : vector<8x64xf32>
    %231 = math.tanh %230 : vector<8x64xf32>
    %cst_110 = arith.constant 1.000000e+00 : f32
    %232 = vector.broadcast %cst_110 : f32 to vector<8x64xf32>
    %233 = arith.addf %232, %231 : vector<8x64xf32>
    %234 = arith.mulf %223, %233 : vector<8x64xf32>
    %235 = arith.truncf %234 : vector<8x64xf32> to vector<8x64xbf16>
    %c1_111 = arith.constant 1 : index
    %c0_112 = arith.constant 0 : index
    %c0_113 = arith.constant 0 : index
    %236 = vector.load %arg8[%c1_111, %c0_112, %c0_113] : memref<2x64x32xbf16, #tpu.memory_space<vmem>>, vector<1x64x32xbf16>
    %237 = vector.shape_cast %236 : vector<1x64x32xbf16> to vector<64x32xbf16>
    %cst_114 = arith.constant dense<0.000000e+00> : vector<8x32xf32>
    %238 = tpu.matmul %235, %237, %cst_114 {dimension_numbers = #tpu.dot_dimension_numbers<[1], [0], [0], [1], [0, 0, 1, 1], [], []>} : vector<8x64xbf16>, vector<64x32xbf16>, vector<8x32xf32> -> vector<8x32xf32>
    %c13 = arith.constant 13 : index
    %c0_115 = arith.constant 0 : index
    %c0_116 = arith.constant 0 : index
    %239 = vector.load %arg9[%c13, %c0_115, %c0_116] : memref<14x1x32xf32, #tpu.memory_space<vmem>>, vector<1x1x32xf32>
    %240 = vector.shape_cast %239 : vector<1x1x32xf32> to vector<1x32xf32>
    %241 = vector.broadcast %240 : vector<1x32xf32> to vector<8x32xf32>
    %242 = arith.addf %238, %241 : vector<8x32xf32>
    %243 = arith.addf %213, %242 : vector<8x32xf32>
    %c10 = arith.constant 10 : index
    %c0_117 = arith.constant 0 : index
    %c0_118 = arith.constant 0 : index
    %244 = vector.load %arg9[%c10, %c0_117, %c0_118] : memref<14x1x32xf32, #tpu.memory_space<vmem>>, vector<1x1x32xf32>
    %245 = vector.shape_cast %244 : vector<1x1x32xf32> to vector<1x32xf32>
    %c11 = arith.constant 11 : index
    %c0_119 = arith.constant 0 : index
    %c0_120 = arith.constant 0 : index
    %246 = vector.load %arg9[%c11, %c0_119, %c0_120] : memref<14x1x32xf32, #tpu.memory_space<vmem>>, vector<1x1x32xf32>
    %247 = vector.shape_cast %246 : vector<1x1x32xf32> to vector<1x32xf32>
    %cst_121 = arith.constant dense<0.000000e+00> : vector<8xf32>
    %248 = vector.multi_reduction <add>, %243, %cst_121 [1] : vector<8x32xf32> to vector<8xf32>
    %249 = vector.shape_cast %248 : vector<8xf32> to vector<8x1xf32>
    %cst_122 = arith.constant 3.200000e+01 : f32
    %250 = vector.broadcast %cst_122 : f32 to vector<8x1xf32>
    %251 = arith.divf %249, %250 : vector<8x1xf32>
    %252 = vector.broadcast %251 : vector<8x1xf32> to vector<8x32xf32>
    %253 = arith.subf %243, %252 : vector<8x32xf32>
    %254 = arith.mulf %253, %253 : vector<8x32xf32>
    %cst_123 = arith.constant dense<0.000000e+00> : vector<8xf32>
    %255 = vector.multi_reduction <add>, %254, %cst_123 [1] : vector<8x32xf32> to vector<8xf32>
    %256 = vector.shape_cast %255 : vector<8xf32> to vector<8x1xf32>
    %cst_124 = arith.constant 3.200000e+01 : f32
    %257 = vector.broadcast %cst_124 : f32 to vector<8x1xf32>
    %258 = arith.divf %256, %257 : vector<8x1xf32>
    %259 = vector.broadcast %251 : vector<8x1xf32> to vector<8x32xf32>
    %260 = arith.subf %243, %259 : vector<8x32xf32>
    %cst_125 = arith.constant 9.99999996E-13 : f32
    %261 = vector.broadcast %cst_125 : f32 to vector<8x1xf32>
    %262 = arith.addf %258, %261 : vector<8x1xf32>
    %263 = math.rsqrt %262 : vector<8x1xf32>
    %264 = vector.broadcast %263 : vector<8x1xf32> to vector<8x32xf32>
    %265 = arith.mulf %260, %264 : vector<8x32xf32>
    %266 = vector.broadcast %245 : vector<1x32xf32> to vector<8x32xf32>
    %267 = arith.mulf %265, %266 : vector<8x32xf32>
    %268 = vector.broadcast %247 : vector<1x32xf32> to vector<8x32xf32>
    %269 = arith.addf %267, %268 : vector<8x32xf32>
    %c0_126 = arith.constant 0 : index
    %c0_127 = arith.constant 0 : index
    %c0_128 = arith.constant 0 : index
    %270 = vector.load %arg12[%c0_126, %c0_127, %c0_128] : memref<1x8x32xf32, #tpu.memory_space<vmem>>, vector<1x8x32xf32>
    %271 = vector.shape_cast %270 : vector<1x8x32xf32> to vector<8x32xf32>
    %272 = vector.shape_cast %269 : vector<8x32xf32> to vector<1x8x32xf32>
    tpu.vector_store %arg12[%c0_126, %c0_127, %c0_128], %272 {strides = array<i32>} : memref<1x8x32xf32, #tpu.memory_space<vmem>>, vector<1x8x32xf32>,
    %273 = arith.truncf %269 : vector<8x32xf32> to vector<8x32xbf16>
    %c0_129 = arith.constant 0 : index
    %c0_130 = arith.constant 0 : index
    %274 = vector.load %arg10[%c0_129, %c0_130] : memref<32x256xbf16, #tpu.memory_space<vmem>>, vector<32x256xbf16>
    %cst_131 = arith.constant dense<0.000000e+00> : vector<8x256xf32>
    %275 = tpu.matmul %273, %274, %cst_131 {dimension_numbers = #tpu.dot_dimension_numbers<[1], [0], [0], [1], [0, 0, 1, 1], [], []>} : vector<8x32xbf16>, vector<32x256xbf16>, vector<8x256xf32> -> vector<8x256xf32>
    %c0_132 = arith.constant 0 : index
    %c0_133 = arith.constant 0 : index
    %276 = vector.load %arg11[%c0_132, %c0_133] : memref<1x256xf32, #tpu.memory_space<vmem>>, vector<1x256xf32>
    %277 = vector.broadcast %276 : vector<1x256xf32> to vector<8x256xf32>
    %278 = arith.addf %275, %277 : vector<8x256xf32>
    %c0_134 = arith.constant 0 : index
    %c0_135 = arith.constant 0 : index
    %c0_136 = arith.constant 0 : index
    %279 = vector.load %arg13[%c0_134, %c0_135, %c0_136] : memref<1x8x256xf32, #tpu.memory_space<vmem>>, vector<1x8x256xf32>
    %280 = vector.shape_cast %279 : vector<1x8x256xf32> to vector<8x256xf32>
    %281 = vector.shape_cast %278 : vector<8x256xf32> to vector<1x8x256xf32>
    tpu.vector_store %arg13[%c0_134, %c0_135, %c0_136], %281 {strides = array<i32>} : memref<1x8x256xf32, #tpu.memory_space<vmem>>, vector<1x8x256xf32>,
    return
  }
  func.func @transform_0(%arg0: i32) -> (i32, i32, i32) {
    %c0_i32 = arith.constant 0 : i32
    %c0_i32_0 = arith.constant 0 : i32
    %c0_i32_1 = arith.constant 0 : i32
    return %arg0, %c0_i32, %c0_i32_0 : i32, i32, i32
  }
  func.func @transform_1(%arg0: i32) -> (i32, i32, i32) {
    %c0_i32 = arith.constant 0 : i32
    %c0_i32_0 = arith.constant 0 : i32
    %c0_i32_1 = arith.constant 0 : i32
    return %arg0, %c0_i32, %c0_i32_0 : i32, i32, i32
  }
  func.func @transform_2(%arg0: i32) -> (i32, i32, i32, i32) {
    %c0_i32 = arith.constant 0 : i32
    %c0_i32_0 = arith.constant 0 : i32
    %c0_i32_1 = arith.constant 0 : i32
    %c0_i32_2 = arith.constant 0 : i32
    %c0_i32_3 = arith.constant 0 : i32
    return %c0_i32, %c0_i32_0, %c0_i32_1, %c0_i32_2 : i32, i32, i32, i32
  }
  func.func @transform_3(%arg0: i32) -> (i32, i32, i32, i32) {
    %c0_i32 = arith.constant 0 : i32
    %c0_i32_0 = arith.constant 0 : i32
    %c0_i32_1 = arith.constant 0 : i32
    %c0_i32_2 = arith.constant 0 : i32
    %c0_i32_3 = arith.constant 0 : i32
    return %c0_i32, %c0_i32_0, %c0_i32_1, %c0_i32_2 : i32, i32, i32, i32
  }
  func.func @transform_4(%arg0: i32) -> (i32, i32, i32, i32) {
    %c0_i32 = arith.constant 0 : i32
    %c0_i32_0 = arith.constant 0 : i32
    %c0_i32_1 = arith.constant 0 : i32
    %c0_i32_2 = arith.constant 0 : i32
    %c0_i32_3 = arith.constant 0 : i32
    return %c0_i32, %c0_i32_0, %c0_i32_1, %c0_i32_2 : i32, i32, i32, i32
  }
  func.func @transform_5(%arg0: i32) -> (i32, i32, i32) {
    %c0_i32 = arith.constant 0 : i32
    %c0_i32_0 = arith.constant 0 : i32
    %c0_i32_1 = arith.constant 0 : i32
    %c0_i32_2 = arith.constant 0 : i32
    return %c0_i32, %c0_i32_0, %c0_i32_1 : i32, i32, i32
  }
  func.func @transform_6(%arg0: i32) -> (i32, i32, i32) {
    %c0_i32 = arith.constant 0 : i32
    %c0_i32_0 = arith.constant 0 : i32
    %c0_i32_1 = arith.constant 0 : i32
    %c0_i32_2 = arith.constant 0 : i32
    return %c0_i32, %c0_i32_0, %c0_i32_1 : i32, i32, i32
  }
  func.func @transform_7(%arg0: i32) -> (i32, i32, i32) {
    %c0_i32 = arith.constant 0 : i32
    %c0_i32_0 = arith.constant 0 : i32
    %c0_i32_1 = arith.constant 0 : i32
    %c0_i32_2 = arith.constant 0 : i32
    return %c0_i32, %c0_i32_0, %c0_i32_1 : i32, i32, i32
  }
  func.func @transform_8(%arg0: i32) -> (i32, i32, i32) {
    %c0_i32 = arith.constant 0 : i32
    %c0_i32_0 = arith.constant 0 : i32
    %c0_i32_1 = arith.constant 0 : i32
    %c0_i32_2 = arith.constant 0 : i32
    return %c0_i32, %c0_i32_0, %c0_i32_1 : i32, i32, i32
  }
  func.func @transform_9(%arg0: i32) -> (i32, i32) {
    %c0_i32 = arith.constant 0 : i32
    %c0_i32_0 = arith.constant 0 : i32
    %c0_i32_1 = arith.constant 0 : i32
    return %c0_i32, %c0_i32_0 : i32, i32
  }
  func.func @transform_10(%arg0: i32) -> (i32, i32) {
    %c0_i32 = arith.constant 0 : i32
    %c0_i32_0 = arith.constant 0 : i32
    %c0_i32_1 = arith.constant 0 : i32
    return %c0_i32, %c0_i32_0 : i32, i32
  }
  func.func @transform_11(%arg0: i32) -> (i32, i32, i32) {
    %c0_i32 = arith.constant 0 : i32
    %c0_i32_0 = arith.constant 0 : i32
    %c0_i32_1 = arith.constant 0 : i32
    return %arg0, %c0_i32, %c0_i32_0 : i32, i32, i32
  }
  func.func @transform_12(%arg0: i32) -> (i32, i32, i32) {
    %c0_i32 = arith.constant 0 : i32
    %c0_i32_0 = arith.constant 0 : i32
    %c0_i32_1 = arith.constant 0 : i32
    return %arg0, %c0_i32, %c0_i32_0 : i32, i32, i32
  }
}

</mosaic_0001>

<bundles_post_ra>
// kernel: tpu_custom_call.1
= control target key start
LH: loop header
LB: loop body
LE: loop exit
PB: predicated region body
PF: predicated region fallthrough
CT: control target
= control target key end

     0   :  { %s4062_s0 = inlined_call_operand.vmem [shape: f32[2,8,32], index: 0, kind: input, shape index: {}]   ;;  %s4063_s1 = inlined_call_operand.vmem [shape: f32[2,1,8], index: 1, kind: input, shape index: {}]   ;;  %s4064_s2 = inlined_call_operand.vmem [shape: bf16[2,6,32,16], index: 2, kind: input, shape index: {}]   ;;  %s4065_s3 = inlined_call_operand.vmem [shape: f32[2,6,1,16], index: 3, kind: input, shape index: {}]   ;;  %s4066_s4 = inlined_call_operand.vmem [shape: bf16[2,2,16,32], index: 4, kind: input, shape index: {}]   ;;  %s4067_s5 = inlined_call_operand.vmem [shape: bf16[2,32,64], index: 5, kind: input, shape index: {}]   ;;  %s4068_s6 = inlined_call_operand.vmem [shape: f32[2,1,64], index: 6, kind: input, shape index: {}]   ;;  %s4069_s7 = inlined_call_operand.vmem [shape: bf16[2,64,32], index: 7, kind: input, shape index: {}]   ;;  %s4070_s8 = inlined_call_operand.vmem [shape: f32[14,1,32], index: 8, kind: input, shape index: {}]   ;;  %s4071_s9 = inlined_call_operand.vmem [shape: bf16[32,256], index: 9, kind: input, shape index: {}]   ;;  %s4072_s10 = inlined_call_operand.vmem [shape: f32[1,256], index: 10, kind: input, shape index: {}]   ;;  %s4073_s11 = inlined_call_operand.hbm [shape: f32[2,8,32], index: 11, kind: output, shape index: {0}]   ;;  %s4074_s12 = inlined_call_operand.hbm [shape: f32[2,8,256], index: 12, kind: output, shape index: {1}]  }
   0x1   :  { %4075 = sst [smem:[#allocation8_spill]] %s4062_s0 }
   0x2   :  { %4076 = sst [smem:[#allocation9_spill]] %s4063_s1 }
   0x3   :  { %4077 = sst [smem:[#allocation10_spill]] %s4064_s2 }
   0x4   :  { %18 = vsyncpa [#allocation3], 0 }
   0x5   :  { %20 = vsyncpa [#allocation3 + $0x1], 0 }
   0x6   :  { %21 = vsyncpa [#allocation5], 0 }
   0x7   :  { %23 = vsyncpa [#allocation5 + $0x1], 0  ;;  %s3531_s21 = smov 0   ;;  %s3533_s22 = smov 0  }
   0x8   :  { %s3535_s23 = smov 0   ;;  %s3537_s24 = smov 0  }
   0x9 LB: > { %s3552_s25 = sadd.s32 4294967295, %s3459_s24   ;;  %s2785_s26 = sadd.s32 4294967294, %s3459_s24   ;;  %s3459_s24 = sphi %s3537_s24, %s4086_s24   ;;  %s3455_s23 = sphi %s3535_s23, %s4085_s23   ;;  %s3451_s22 = sphi %s3533_s22, %s4084_s22   ;;  %s3447_s21 = sphi %s3531_s21, %s4083_s21  }
   0xa   : > { %s3556_s27 = sadd.s32 1, %s3459_s24   ;;  %s277_s28 = sadd.s32 1, %s3455_s23 }
   0xb   : > { %s274_s29 = ssub.s32 %s3459_s24, %s3556_s27  ;;  %p287_p0 = scmp.ne.s32.totalorder %s3455_s23, %s3451_s22 }
   0xc   : > { %p275_p1 = scmp.eq.s32.totalorder %s274_s29, 0  ;;  %p288_p2 = scmp.eq.s32.totalorder %s3552_s25, 1 }
   0xd   : > { %p293_p3 = scmp.ne.s32.totalorder %s3451_s22, %s3447_s21  ;;  %p294_p4 = scmp.eq.s32.totalorder %s2785_s26, 1 }
   0xe   : > { %s3567_s30 = scalar_select %p275_p1, %s3455_s23, %s277_s28  }
   0xf   : > { %p3569_p5 = por %p288_p2, %p287_p0  ;;  %p3573_p6 = por %p294_p4, %p293_p3 }
  0x10   : > { %p2788_p7 = scmp.ge.s32.totalorder %s3459_s24, 1  ;;  %p378_p8 = scmp.lt.s32.totalorder %s3459_s24, 3 }
  0x12   : > { %p379_p9 = pnand %p2788_p7, %p378_p8 }
  0x13   : > { %p427_p10 = scmp.lt.s32.totalorder (!%p379_p9), %s3552_s25, 1  ;;  %vm439_vm0 = vcmask (!%p379_p9), 261120   ;;  %s4080_s0 = sld [smem:[#allocation8_spill]] (!%p379_p9)  ;;  %v3461_v9 = vmov (!%p379_p9), 0.0   ;;  %vm3462_vm1 = vmmov (!%p379_p9), 0   ;;  %vm857_vm2 = vcmask (!%p379_p9), 130048  }
  0x14   : > { %382 = sbr.rel (%p379_p9) target bundleno = 5134 (0x140e), region = 64  ;;  %s4081_s2 = sld [smem:[#allocation10_spill]] (!%p379_p9)  ;;  %3042 = vmatprep.subr.bf16.mxu0 (!%p379_p9), %v3461_v9  ;;  %3050 = vmatprep.subr.bf16.mxu1 (!%p379_p9), %v3461_v9  ;;  %v2793_v16 = vld [vmem:[%s4070_s8] ss:$0 sm:$0xff] (!%p379_p9)  ;;  %v2794_v18 = vld [vmem:[%s4070_s8 + $0x1] ss:$0 sm:$0xff] (!%p379_p9) }
  0x15   : > { %3046 = vmatprep.mubr.msk.bf16.mxu0 (!%p379_p9), %vm3462_vm1, %v3461_v9  ;;  %3054 = vmatprep.mubr.msk.bf16.mxu1 (!%p379_p9), %vm3462_vm1, %v3461_v9  ;;  %v2797_v38 = vld [vmem:[%s4065_s3 + $0x2] ss:$0 sm:$0xff] (!%p379_p9)  ;;  %v2798_v39 = vld [vmem:[%s4065_s3 + $0x3] ss:$0 sm:$0xff] (!%p379_p9)  ;;  %v2795_v42 = vld [vmem:[%s4065_s3] ss:$0 sm:$0xff] (!%p379_p9) }
  0x16   : > { %v2796_v43 = vld [vmem:[%s4065_s3 + $0x1] ss:$0 sm:$0xff] (!%p379_p9)  ;;  %v2799_v54 = vld [vmem:[%s4065_s3 + $0x4] ss:$0 sm:$0xff] (!%p379_p9)  ;;  %v2800_v55 = vld [vmem:[%s4065_s3 + $0x5] ss:$0 sm:$0xff] (!%p379_p9) }
  0x17   : > { %s4082_s1 = sld [smem:[#allocation9_spill]] (!%p379_p9)  ;;  %vm1010_vm3 = vcmask (!%p379_p9), 64512   ;;  %vm1444_vm4 = vcmask (!%p379_p9), 523264   ;;  %s3976_s29 = sand.u32 (!%p379_p9), 1, %s3451_s22  }
  0x18   : > { %s2789_s18 = sshll.u32 (!%p379_p9), %s3976_s29, 3 }
  0x19   : > { %s419_s26 = scalar_lea.vmem (!%p379_p9), [#allocation2], %s2789_s18 }
  0x1a   : > { %v3289_v7 = vld [vmem:[%s4081_s2] sm:$0xff] (!%p379_p9)   ;;  %v3290_v8 = vld [vmem:[%s4081_s2 + $0x10] sm:$0xff] (!%p379_p9)   ;;  %v3291_v10 = vld [vmem:[%s4081_s2 + $0x8] sm:$0xff] (!%p379_p9)  }
  0x1b   : > { %s3581_s15 = scalar_select %p427_p10, %s3552_s25, 1  ;;  %3043 = vmatpush3.bf16.msra.mxu0 %v3289_v7  ;;  %3051 = vmatpush3.bf16.msra.mxu1 %v3290_v8  ;;  %v3292_v11 = vld [vmem:[%s4081_s2 + $0x18] sm:$0xff]   ;;  %v3293_v21 = vld [vmem:[%s4081_s2 + $0x20] sm:$0xff]   ;;  %v3294_v22 = vld [vmem:[%s4081_s2 + $0x30] sm:$0xff]  }
  0x1c   : > { %3044 = vmatprep.subr.bf16.mxu0 %v3461_v9  ;;  %3052 = vmatprep.subr.bf16.mxu1 %v3461_v9  ;;  %v3295_v24 = vld [vmem:[%s4081_s2 + $0x28] sm:$0xff]   ;;  %v3296_v25 = vld [vmem:[%s4081_s2 + $0x38] sm:$0xff]   ;;  %v3297_v26 = vld [vmem:[%s4081_s2 + $0x40] sm:$0xff]  }
  0x1d   : > { %s2791_s16 = sshll.u32 %s3581_s15, 3  ;;  %v3298_v27 = vld [vmem:[%s4081_s2 + $0x50] sm:$0xff]   ;;  %v3299_v28 = vld [vmem:[%s4081_s2 + $0x48] sm:$0xff]   ;;  %v3300_v29 = vld [vmem:[%s4081_s2 + $0x58] sm:$0xff]   ;;  %s433_s28 = scalar_lea.vmem %s4082_s1, %s3581_s15 }
  0x1e   : > { %s430_s19 = scalar_lea.vmem %s4080_s0, %s2791_s16  ;;  %s2671_s15 = sshll.u32 %s419_s26, 4  ;;  %s2672_s15 = int_to_ptr.vmem [resolvable:$true] %s2671_s15 }
  0x1f   : > { %v435_v0 = vld [vmem:[%s430_s19] sm:$0xff]  ;;  %3045 = vmatpush3.bf16.msra.mxu0 %v3291_v10  ;;  %3053 = vmatpush3.bf16.msra.mxu1 %v3292_v11  ;;  %s2653_s1 = scalar_lea.sflag [#allocation3], %s3976_s29  ;;  %s3464_s19 = smov [#allocation2]  }
  0x20   : > { %v440_v1 = vsel %vm439_vm0, %v435_v0, 0.0  ;;  %3058 = vmatprep.subr.bf16.mxu0 %v3461_v9  ;;  %3066 = vmatprep.subr.bf16.mxu1 %v3461_v9  ;;  %s3369_s18 = sshll.u32 %s3464_s19, 4  ;;  %s3370_s18 = int_to_ptr.vmem [resolvable:$false] %s3369_s18 }
  0x21   : > { %441 = vadd.xlane.f32.xlu0 %v440_v1  ;;  %s3371_s20 = scalar_lea.vmem %s3370_s18, 256  ;;  %p3372_p0 = scmp.lt.s32.totalorder %s2672_s15, %s3370_s18 }
  0xae   : > { %v442_v2 = vpop.xlane.xlu0 %441 }
  0xaf   : > { %v444_v3 = vmul.f32 0.03125, %v442_v2  ;;  %v3705_v2 = vld [vmem:[%s433_s28] ss:$0 sm:$0xff]  ;;  %s2960_s28 = sshll.u32 %s3552_s25, 7 }
  0xb0   : > { %s3991_s17 = scalar_lea.hbm %s4073_s11, %s2960_s28 }
  0xb1   : > { %v445_v4 = vsub.f32 %v435_v0, %v444_v3 }
  0xb3   : > { %v446_v5 = vmul.f32 %v445_v4, %v445_v4 }
  0xb5   : > { %v447_v6 = vsel %vm439_vm0, %v446_v5, 0.0 }
  0xb6   : > { %448 = vadd.xlane.f32.xlu0 %v447_v6 }
 0x143   : > { %v449_v12 = vpop.xlane.xlu0 %448 }
 0x144   : > { %v450_v13 = vmul.f32 0.03125, %v449_v12 }
 0x146   : > { %v451_v14 = vadd.f32 1e-12, %v450_v13 }
 0x148   : > { %3335 = vrsqrt.f32 %v451_v14 }
 0x152   : > { %v3336_v15 = vpop.eup %3335 }
 0x153   : > { %v453_v17 = vmul.f32 %v3336_v15, %v445_v4 }
 0x155   : > { %v460_v19 = vmul.f32 %v2793_v16, %v453_v17 }
 0x157   : > { %v3617_v20 = vadd.f32 %v2794_v18, %v460_v19 }
 0x159   : > { %v469_v23 = vpack.c.bf16 %v3617_v20, %v3617_v20 }
 0x15b   : > { %3047 = vmatmul.mubr.msk.bf16.vlgmr.msra.gmra.mrb[0].mxu0 %vm439_vm0, %v469_v23  ;;  %3055 = vmatmul.mubr.msk.bf16.vlgmr.msra.gmra.mrb[0].mxu1 %vm439_vm0, %v469_v23 }
 0x15c   : > { %3059 = vmatpush3.bf16.msra.mxu0 %v3293_v21  ;;  %3067 = vmatpush3.bf16.msra.mxu1 %v3294_v22 }
 0x15d   : > { %3060 = vmatprep.subr.bf16.mxu0 %v3461_v9  ;;  %3068 = vmatprep.subr.bf16.mxu1 %v3461_v9 }
 0x15e   : > { %3062 = vmatprep.mubr.msk.bf16.mxu0 %vm3462_vm1, %v3461_v9  ;;  %3070 = vmatprep.mubr.msk.bf16.mxu1 %vm3462_vm1, %v3461_v9 }
 0x160   : > { %3061 = vmatpush3.bf16.msra.mxu0 %v3295_v24  ;;  %3069 = vmatpush3.bf16.msra.mxu1 %v3296_v25 }
 0x161   : > { %3074 = vmatprep.subr.bf16.mxu0 %v3461_v9  ;;  %3082 = vmatprep.subr.bf16.mxu1 %v3461_v9 }
 0x163   : > { %3063 = vmatmul.mubr.msk.bf16.vlgmr.msra.gmra.mrb[4].mxu0 %vm439_vm0, %v469_v23  ;;  %3071 = vmatmul.mubr.msk.bf16.vlgmr.msra.gmra.mrb[4].mxu1 %vm439_vm0, %v469_v23 }
 0x164   : > { %3075 = vmatpush3.bf16.msra.mxu0 %v3297_v26  ;;  %3083 = vmatpush3.bf16.msra.mxu1 %v3298_v27 }
 0x165   : > { %3076 = vmatprep.subr.bf16.mxu0 %v3461_v9  ;;  %3084 = vmatprep.subr.bf16.mxu1 %v3461_v9 }
 0x166   : > { %3078 = vmatprep.mubr.msk.bf16.mxu0 %vm3462_vm1, %v3461_v9  ;;  %3086 = vmatprep.mubr.msk.bf16.mxu1 %vm3462_vm1, %v3461_v9 }
 0x168   : > { %3077 = vmatpush3.bf16.msra.mxu0 %v3299_v28  ;;  %3085 = vmatpush3.bf16.msra.mxu1 %v3300_v29  ;;  %v3301_v29 = vld [vmem:[%s4066_s4] sm:$0xff]  }
 0x169   : > { %3090 = vmatprep.subr.mxu0 %v3461_v9  ;;  %3095 = vmatprep.subr.mxu1 %v3461_v9 }
 0x16b   : > { %3079 = vmatmul.mubr.msk.bf16.vlgmr.msra.gmra.mrb[8].mxu0 %vm439_vm0, %v469_v23  ;;  %3087 = vmatmul.mubr.msk.bf16.vlgmr.msra.gmra.mrb[8].mxu1 %vm439_vm0, %v469_v23 }
 0x16c   : > { %3092 = vmatprep.mubr.msk.f32.mxu0 %vm3462_vm1, %v3461_v9  ;;  %3097 = vmatprep.mubr.msk.f32.mxu1 %vm3462_vm1, %v3461_v9 }
 0x22e   : > { %v585_v30 = vpop.f32.mrb[0].mxu0  ;;  %v637_v31 = vpop.f32.mrb[0].mxu1 }
 0x22f   : > { %v3048_v32 = vpop.f32.mrb[1].mxu0  ;;  %v3056_v33 = vpop.f32.mrb[1].mxu1  ;;  %v586_v52 = vadd.f32 %v2795_v42, %v585_v30  ;;  %v638_v53 = vadd.f32 %v2796_v43, %v637_v31  ;;  %v3302_v30 = vld [vmem:[%s4066_s4 + $0x8] sm:$0xff]  }
 0x230   : > { %v588_v34 = vpop.f32.mrb[2].mxu0  ;;  %v640_v35 = vpop.f32.mrb[2].mxu1 }
 0x231   : > { %v3049_v36 = vpop.f32.mrb[3].mxu0  ;;  %v3057_v37 = vpop.f32.mrb[3].mxu1 }
 0x236   : > { %v689_v40 = vpop.f32.mrb[4].mxu0  ;;  %v741_v41 = vpop.f32.mrb[4].mxu1 }
 0x237   : > { %v690_v44 = vadd.f32 %v2797_v38, %v689_v40  ;;  %v742_v45 = vadd.f32 %v2798_v39, %v741_v41  ;;  %v3064_v46 = vpop.f32.mrb[5].mxu0  ;;  %v3072_v47 = vpop.f32.mrb[5].mxu1 }
 0x238   : > { %v692_v48 = vpop.f32.mrb[6].mxu0  ;;  %v744_v49 = vpop.f32.mrb[6].mxu1 }
 0x239   : > { %v3065_v50 = vpop.f32.mrb[7].mxu0  ;;  %v3073_v51 = vpop.f32.mrb[7].mxu1  ;;  %3091 = vmatpush3.xpose.msk.msra.mxu0 %vm857_vm2, %v690_v44  ;;  %3096 = vmatpush3.xpose.msk.msra.mxu1 %vm857_vm2, %v742_v45  ;;  %v2831_v44 = vld [vmem:[%s4070_s8 + $0x6] ss:$0 sm:$0xff] }
 0x23a   : > { %3100 = vmatprep.subr.mxu0 %v3461_v9  ;;  %3105 = vmatprep.subr.mxu1 %v3461_v9 }
 0x23c   : > { %3093 = vmatmul.mubr.msk.f32.vlgmr.msra.gmra.mrb[12].mxu0 %vm857_vm2, %v586_v52  ;;  %3098 = vmatmul.mubr.msk.f32.vlgmr.msra.gmra.mrb[12].mxu1 %vm857_vm2, %v638_v53 }
 0x23d   : > { %3102 = vmatprep.mubr.msk.f32.mxu0 %vm3462_vm1, %v3461_v9  ;;  %3107 = vmatprep.mubr.msk.f32.mxu1 %vm3462_vm1, %v3461_v9 }
 0x23e   : > { %v793_v56 = vpop.f32.mrb[8].mxu0  ;;  %v845_v57 = vpop.f32.mrb[8].mxu1 }
 0x23f   : > { %v794_v58 = vadd.f32 %v2799_v54, %v793_v56  ;;  %v846_v59 = vadd.f32 %v2800_v55, %v845_v57  ;;  %v3080_v60 = vpop.f32.mrb[9].mxu0  ;;  %v3088_v61 = vpop.f32.mrb[9].mxu1  ;;  %v3303_v57 = vld [vmem:[%s4067_s5] sm:$0xff]  }
 0x240   : > { %v796_v62 = vpop.f32.mrb[10].mxu0  ;;  %v848_v63 = vpop.f32.mrb[10].mxu1 }
 0x241   : > { %v3081_v0 = vpop.f32.mrb[11].mxu0  ;;  %v3089_v1 = vpop.f32.mrb[11].mxu1  ;;  %3101 = vmatpush3.msra.mxu0 %v794_v58  ;;  %3106 = vmatpush3.msra.mxu1 %v846_v59  ;;  %v2834_v62 = vld [vmem:[%s4070_s8 + $0x2] ss:$0 sm:$0xff] }
 0x242   : > { %3110 = vmatprep.subr.bf16.mxu0 %v3461_v9  ;;  %3116 = vmatprep.subr.bf16.mxu1 %v3461_v9  ;;  %v2835_v0 = vld [vmem:[%s4070_s8 + $0x3] ss:$0 sm:$0xff] }
 0x30f   : > { %v930_v3 = vpop.f32.mrb[12].mxu0  ;;  %v1006_v4 = vpop.f32.mrb[12].mxu1 }
 0x310   : > { %v931_v5 = vadd.f32 %v3705_v2, %v930_v3  ;;  %v3094_v6 = vpop.f32.mrb[13].mxu0  ;;  %v3099_v7 = vpop.f32.mrb[13].mxu1  ;;  %v1007_v8 = vadd.f32 %v3705_v2, %v1006_v4 }
 0x311   : > { %v3306_v6 = vld [vmem:[%s4069_s7 + $0x8] sm:$0xff]   ;;  %v3307_v7 = vld [vmem:[%s4069_s7 + $0x10] sm:$0xff]  }
 0x312   : > { %v1011_v10 = vsel %vm1010_vm3, %v931_v5, -inf  ;;  %v1014_v11 = vsel %vm1010_vm3, %v1007_v8, -inf }
 0x313   : > { %1012 = vmax.xlane.f32.xlu1 %v1011_v10  ;;  %v2836_v10 = vld [vmem:[%s4068_s6] ss:$0 sm:$0xff] }
 0x317   : > { %1015 = vmax.xlane.f32.xlu1 %v1014_v11 }
 0x3a0   : > { %v1013_v12 = vpop.xlane.xlu1 %1012 }
 0x3a1   : > { %v1017_v13 = vsub.f32 %v931_v5, %v1013_v12  ;;  %v3305_v5 = vld [vmem:[%s4069_s7] sm:$0xff]  }
 0x3a3   : > { %v1019_v14 = vmul.f32 1.442695, %v1017_v13 }
 0x3a4   : > { %v1016_v15 = vpop.xlane.xlu1 %1015 }
 0x3a5   : > { %3337 = vpow2.f32 %v1019_v14  ;;  %v1018_v16 = vsub.f32 %v1007_v8, %v1016_v15  ;;  %v3308_v8 = vld [vmem:[%s4069_s7 + $0x18] sm:$0xff]  }
 0x3a7   : > { %v1021_v17 = vmul.f32 1.442695, %v1018_v16 }
 0x3a9   : > { %3339 = vpow2.f32 %v1021_v17 }
 0x3af   : > { %v3338_v18 = vpop.eup %3337 }
 0x3b0   : > { %v1023_v19 = vsel %vm1010_vm3, %v3338_v18, 0.0 }
 0x3b1   : > { %1024 = vadd.xlane.f32.xlu0 %v1023_v19 }
 0x3b3   : > { %v3340_v21 = vpop.eup %3339 }
 0x3b4   : > { %v1026_v22 = vsel %vm1010_vm3, %v3340_v21, 0.0 }
 0x3b5   : > { %1027 = vadd.xlane.f32.xlu1 %v1026_v22 }
 0x43e   : > { %v1025_v23 = vpop.xlane.xlu0 %1024 }
 0x43f   : > { %3341 = vrcp.f32 %v1025_v23 }
 0x442   : > { %v1028_v24 = vpop.xlane.xlu1 %1027 }
 0x443   : > { %3343 = vrcp.f32 %v1028_v24 }
 0x449   : > { %v3342_v25 = vpop.eup %3341 }
 0x44a   : > { %v1031_v26 = vmul.f32 %v3342_v25, %v3338_v18 }
 0x44c   : > { %3103 = vmatmul.mubr.msk.f32.vlgmr.msra.gmra.mrb[14].mxu0 %vm1010_vm3, %v1031_v26 }
 0x44d   : > { %v3344_v27 = vpop.eup %3343  ;;  %3112 = vmatprep.mubr.msk.bf16.mxu0 %vm3462_vm1, %v3461_v9  ;;  %3111 = vmatpush3.bf16.msra.mxu0 %v3301_v29 }
 0x44e   : > { %v1032_v28 = vmul.f32 %v3344_v27, %v3340_v21  ;;  %3122 = vmatprep.subr.bf16.mxu0 %v3461_v9  ;;  %v2841_v27 = vld [vmem:[%s4070_s8 + $0x7] ss:$0 sm:$0xff] }
 0x450   : > { %3108 = vmatmul.mubr.msk.f32.vlgmr.msra.gmra.mrb[14].mxu1 %vm1010_vm3, %v1032_v28 }
 0x451   : > { %3118 = vmatprep.mubr.msk.bf16.mxu1 %vm3462_vm1, %v3461_v9  ;;  %3117 = vmatpush3.bf16.msra.mxu1 %v3302_v30 }
 0x452   : > { %3130 = vmatprep.subr.bf16.mxu1 %v3461_v9 }
 0x51f   : > { %v1102_v31 = vpop.f32.mrb[14].mxu0 }
 0x520   : > { %v1179_v32 = vpack.c.bf16 %v1102_v31, %v1102_v31  ;;  %v3104_v33 = vpop.f32.mrb[15].mxu0 }
 0x522   : > { %3113 = vmatmul.mubr.msk.bf16.vlgmr.msra.gmra.mrb[16].mxu0 %vm857_vm2, %v1179_v32 }
 0x523   : > { %v1175_v34 = vpop.f32.mrb[14].mxu1  ;;  %3126 = vmatprep.mubr.msk.bf16.mxu0 %vm3462_vm1, %v3461_v9  ;;  %3123 = vmatpush3.bf16.msra.mxu0 %v3303_v57  ;;  %v3316_v57 = vld [vmem:[%s4081_s2 + $0xa8] sm:$0xff]  }
 0x524   : > { %v1180_v35 = vpack.c.bf16 %v1175_v34, %v1175_v34  ;;  %v3109_v36 = vpop.f32.mrb[15].mxu1  ;;  %3124 = vmatprep.subr.bf16.mxu0 %v3461_v9 }
 0x526   : > { %3119 = vmatmul.mubr.msk.bf16.vlgmr.msra.gmra.mrb[16].mxu1 %vm857_vm2, %v1180_v35 }
 0x527   : > { %3138 = vmatprep.mubr.msk.bf16.mxu1 %vm3462_vm1, %v3461_v9  ;;  %3131 = vmatpush3.bf16.msra.mxu1 %v3305_v5 }
 0x528   : > { %3132 = vmatprep.subr.bf16.mxu1 %v3461_v9 }
 0x52b   : > { %3133 = vmatpush3.bf16.msra.mxu1 %v3306_v6 }
 0x52c   : > { %3134 = vmatprep.subr.bf16.mxu1 %v3461_v9 }
 0x52f   : > { %3135 = vmatpush3.bf16.msra.mxu1 %v3307_v7 }
 0x530   : > { %3136 = vmatprep.subr.bf16.mxu1 %v3461_v9 }
 0x533   : > { %3137 = vmatpush3.bf16.msra.mxu1 %v3308_v8 }
 0x534   : > { %3158 = vmatprep.subr.bf16.mxu1 %v3461_v9 }
 0x5f5   : > { %v1228_v37 = vpop.f32.mrb[16].mxu0 }
 0x5f6   : > { %v3114_v38 = vpop.f32.mrb[17].mxu0  ;;  %v1283_v42 = vsel %vm439_vm0, %v1228_v37, 0.0 }
 0x5f7   : > { %v1231_v39 = vpop.f32.mrb[18].mxu0 }
 0x5f8   : > { %v3115_v40 = vpop.f32.mrb[19].mxu0 }
 0x5f9   : > { %v1277_v41 = vpop.f32.mrb[16].mxu1  ;;  %v3309_v40 = vld [vmem:[%s4081_s2 + $0x60] sm:$0xff]  }
 0x5fa   : > { %v1284_v43 = vsel %vm439_vm0, %v1277_v41, 0.0  ;;  %v3120_v45 = vpop.f32.mrb[17].mxu1  ;;  %v3310_v41 = vld [vmem:[%s4081_s2 + $0x80] sm:$0xff]  }
 0x5fb   : > { %v1285_v46 = vadd.f32 %v1284_v43, %v1283_v42  ;;  %v1280_v47 = vpop.f32.mrb[18].mxu1  ;;  %v3311_v42 = vld [vmem:[%s4081_s2 + $0x68] sm:$0xff]  }
 0x5fc   : > { %v3121_v48 = vpop.f32.mrb[19].mxu1  ;;  %v3312_v43 = vld [vmem:[%s4081_s2 + $0x88] sm:$0xff]  }
 0x5fd   : > { %v1294_v49 = vadd.f32 %v2831_v44, %v1285_v46  ;;  %v2849_v48 = vld [vmem:[%s4070_s8 + $0x4] ss:$0 sm:$0xff] }
 0x5ff   : > { %v1295_v50 = vadd.f32 %v1294_v49, %v3617_v20  ;;  %v3304_v20 = vld [vmem:[%s4067_s5 + $0x8] sm:$0xff]  }
 0x600   : > { %3125 = vmatpush3.bf16.msra.mxu0 %v3304_v20  ;;  %v3317_v20 = vld [vmem:[%s4081_s2 + $0x90] sm:$0xff]  }
 0x601   : > { %v1300_v51 = vsel %vm439_vm0, %v1295_v50, 0.0  ;;  %3142 = vmatprep.subr.bf16.mxu0 %v3461_v9 }
 0x602   : > { %1301 = vadd.xlane.f32.xlu0 %v1300_v51 }
 0x68f   : > { %v1302_v52 = vpop.xlane.xlu0 %1301 }
 0x690   : > { %v1303_v53 = vmul.f32 0.03125, %v1302_v52 }
 0x692   : > { %v1304_v54 = vsub.f32 %v1295_v50, %v1303_v53  ;;  %v2850_v50 = vld [vmem:[%s4070_s8 + $0x5] ss:$0 sm:$0xff]  ;;  %v3313_v53 = vld [vmem:[%s4081_s2 + $0x70] sm:$0xff]  }
 0x694   : > { %v1305_v55 = vmul.f32 %v1304_v54, %v1304_v54 }
 0x696   : > { %v1306_v56 = vsel %vm439_vm0, %v1305_v55, 0.0 }
 0x697   : > { %1307 = vadd.xlane.f32.xlu1 %v1306_v56  ;;  %v3315_v56 = vld [vmem:[%s4081_s2 + $0x78] sm:$0xff]  }
 0x724   : > { %v1308_v58 = vpop.xlane.xlu1 %1307 }
 0x725   : > { %v1309_v59 = vmul.f32 0.03125, %v1308_v58  ;;  %v3318_v58 = vld [vmem:[%s4081_s2 + $0x98] sm:$0xff]  }
 0x727   : > { %v1310_v60 = vadd.f32 1e-12, %v1309_v59  ;;  %v3319_v59 = vld [vmem:[%s4081_s2 + $0xb0] sm:$0xff]  }
 0x729   : > { %3345 = vrsqrt.f32 %v1310_v60  ;;  %v3320_v60 = vld [vmem:[%s4081_s2 + $0xb8] sm:$0xff]  }
 0x733   : > { %v3346_v61 = vpop.eup %3345 }
 0x734   : > { %v1312_v63 = vmul.f32 %v3346_v61, %v1304_v54  ;;  %v3314_v54 = vld [vmem:[%s4081_s2 + $0xa0] sm:$0xff]   ;;  %v2883_v61 = vld [vmem:[%s4065_s3 + $0x8] ss:$0 sm:$0xff]  ;;  %s3365_s2 = scalar_lea.vmem %s2672_s15, 128 }
 0x735   : > { %p3366_p11 = scmp.ne.s32.totalorder %s2672_s15, %s3365_s2  ;;  %p3373_p1 = scmp.lt.s32.totalorder %s3371_s20, %s3365_s2 }
 0x736   : > { %v1319_v1 = vmul.f32 %v2834_v62, %v1312_v63 }
 0x737   : > { %p3367_p12 = pnand %p3366_p11, %p3569_p5  ;;  %p3374_p2 = por %p3373_p1, %p3372_p0 }
 0x738   : > { %v1326_v3 = vadd.f32 %v2835_v0, %v1319_v1  ;;  %v2881_v0 = vld [vmem:[%s4065_s3 + $0x6] ss:$0 sm:$0xff] }
 0x739   : > { %p3368_p13 = pneg %p3367_p12 }
 0x73a   : > { %v1327_v4 = vpack.c.bf16 %v1326_v3, %v1326_v3 }
 0x73b   : > { %p3375_p3 = pnand %p3374_p2, %p3368_p13 }
 0x73c   : > { %3127 = vmatmul.mubr.msk.bf16.vlgmr.msra.gmra.mrb[20].mxu0 %vm439_vm0, %v1327_v4 }
 0x73d   : > { %3146 = vmatprep.mubr.msk.bf16.mxu0 %vm3462_vm1, %v3461_v9  ;;  %3143 = vmatpush3.bf16.msra.mxu0 %v3309_v40 }
 0x73e   : > { %3144 = vmatprep.subr.bf16.mxu0 %v3461_v9 }
 0x741   : > { %3145 = vmatpush3.bf16.msra.mxu0 %v3311_v42 }
 0x742   : > { %3150 = vmatprep.subr.bf16.mxu0 %v3461_v9 }
 0x80f   : > { %v1388_v11 = vpop.f32.mrb[20].mxu0 }
 0x810   : > { %v1389_v12 = vadd.f32 %v2836_v10, %v1388_v11  ;;  %v3128_v13 = vpop.f32.mrb[21].mxu0  ;;  %v2885_v11 = vld [vmem:[%s4065_s3 + $0xa] ss:$0 sm:$0xff] }
 0x811   : > { %v1391_v14 = vpop.f32.mrb[22].mxu0 }
 0x812   : > { %v1395_v15 = vmul.f32 0.044715, %v1389_v12  ;;  %v3129_v16 = vpop.f32.mrb[23].mxu0  ;;  %v1394_v23 = vmul.f32 0.5, %v1389_v12 }
 0x814   : > { %v1396_v17 = vmul.f32 %v1395_v15, %v1389_v12 }
 0x816   : > { %v1397_v18 = vmul.f32 %v1396_v17, %v1389_v12 }
 0x818   : > { %v1398_v19 = vadd.f32 %v1397_v18, %v1389_v12 }
 0x81a   : > { %v1399_v21 = vmul.f32 0.7978846, %v1398_v19 }
 0x81c   : > { %3347 = vtanh.f32 %v1399_v21 }
 0x826   : > { %v3348_v22 = vpop.eup %3347 }
 0x827   : > { %v1401_v24 = vadd.f32 1.0, %v3348_v22  ;;  %v2884_v22 = vld [vmem:[%s4065_s3 + $0x9] ss:$0 sm:$0xff] }
 0x829   : > { %v1402_v25 = vmul.f32 %v1401_v24, %v1394_v23  ;;  %v2882_v24 = vld [vmem:[%s4065_s3 + $0x7] ss:$0 sm:$0xff] }
 0x82b   : > { %v1403_v26 = vpack.c.bf16 %v1402_v25, %v1402_v25 }
 0x82d   : > { %3139 = vmatmul.mubr.msk.bf16.vlgmr.msra.gmra.mrb[20].mxu1 %vm1444_vm4, %v1403_v26 }
 0x82e   : > { %3162 = vmatprep.mubr.msk.bf16.mxu1 %vm3462_vm1, %v3461_v9  ;;  %3159 = vmatpush3.bf16.msra.mxu1 %v3310_v41 }
 0x82f   : > { %3160 = vmatprep.subr.bf16.mxu1 %v3461_v9 }
 0x832   : > { %3161 = vmatpush3.bf16.msra.mxu1 %v3312_v43 }
 0x833   : > { %3174 = vmatprep.subr.bf16.mxu1 %v3461_v9 }
 0x900   : > { %v1482_v28 = vpop.f32.mrb[20].mxu1 }
 0x901   : > { %v1483_v29 = vadd.f32 %v2841_v27, %v1482_v28  ;;  %v3140_v30 = vpop.f32.mrb[21].mxu1 }
 0x902   : > { %v1485_v31 = vpop.f32.mrb[22].mxu1  ;;  %v2886_v30 = vld [vmem:[%s4065_s3 + $0xb] ss:$0 sm:$0xff] }
 0x903   : > { %v3141_v32 = vpop.f32.mrb[23].mxu1  ;;  %v1488_v33 = vadd.f32 %v1483_v29, %v1326_v3 }
 0x905   : > { %v1493_v34 = vsel %vm439_vm0, %v1488_v33, 0.0 }
 0x906   : > { %1494 = vadd.xlane.f32.xlu0 %v1493_v34 }
 0x993   : > { %v1495_v35 = vpop.xlane.xlu0 %1494 }
 0x994   : > { %v1496_v36 = vmul.f32 0.03125, %v1495_v35 }
 0x996   : > { %v1497_v37 = vsub.f32 %v1488_v33, %v1496_v36 }
 0x998   : > { %v1498_v38 = vmul.f32 %v1497_v37, %v1497_v37 }
 0x99a   : > { %v1499_v39 = vsel %vm439_vm0, %v1498_v38, 0.0 }
 0x99b   : > { %1500 = vadd.xlane.f32.xlu1 %v1499_v39 }
 0xa28   : > { %v1501_v44 = vpop.xlane.xlu1 %1500 }
 0xa29   : > { %v1502_v45 = vmul.f32 0.03125, %v1501_v44 }
 0xa2b   : > { %v1503_v46 = vadd.f32 1e-12, %v1502_v45 }
 0xa2d   : > { %3349 = vrsqrt.f32 %v1503_v46 }
 0xa37   : > { %v3350_v47 = vpop.eup %3349 }
 0xa38   : > { %v1505_v49 = vmul.f32 %v3350_v47, %v1497_v37 }
 0xa3a   : > { %v1512_v51 = vmul.f32 %v2849_v48, %v1505_v49 }
 0xa3c   : > { %v3807_v52 = vadd.f32 %v2850_v50, %v1512_v51 }
 0xa3e   : > { %v1520_v55 = vpack.c.bf16 %v3807_v52, %v3807_v52 }
 0xa40   : > { %3147 = vmatmul.mubr.msk.bf16.vlgmr.msra.gmra.mrb[24].mxu0 %vm439_vm0, %v1520_v55  ;;  %3163 = vmatmul.mubr.msk.bf16.vlgmr.msra.gmra.mrb[24].mxu1 %vm439_vm0, %v1520_v55 }
 0xa41   : > { %3151 = vmatpush3.bf16.msra.mxu0 %v3313_v53  ;;  %3175 = vmatpush3.bf16.msra.mxu1 %v3314_v54 }
 0xa42   : > { %3152 = vmatprep.subr.bf16.mxu0 %v3461_v9  ;;  %3176 = vmatprep.subr.bf16.mxu1 %v3461_v9 }
 0xa43   : > { %3154 = vmatprep.mubr.msk.bf16.mxu0 %vm3462_vm1, %v3461_v9  ;;  %3178 = vmatprep.mubr.msk.bf16.mxu1 %vm3462_vm1, %v3461_v9 }
 0xa45   : > { %3153 = vmatpush3.bf16.msra.mxu0 %v3315_v56  ;;  %3177 = vmatpush3.bf16.msra.mxu1 %v3316_v57 }
 0xa46   : > { %3166 = vmatprep.subr.bf16.mxu0 %v3461_v9  ;;  %3190 = vmatprep.subr.mxu1 %v3461_v9 }
 0xa48   : > { %3155 = vmatmul.mubr.msk.bf16.vlgmr.msra.gmra.mrb[28].mxu0 %vm439_vm0, %v1520_v55  ;;  %3179 = vmatmul.mubr.msk.bf16.vlgmr.msra.gmra.mrb[28].mxu1 %vm439_vm0, %v1520_v55 }
 0xa49   : > { %3167 = vmatpush3.bf16.msra.mxu0 %v3317_v20  ;;  %3170 = vmatprep.mubr.msk.bf16.mxu0 %vm3462_vm1, %v3461_v9 }
 0xa4a   : > { %3168 = vmatprep.subr.bf16.mxu0 %v3461_v9  ;;  %3192 = vmatprep.mubr.msk.f32.mxu1 %vm3462_vm1, %v3461_v9 }
 0xa4d   : > { %3169 = vmatpush3.bf16.msra.mxu0 %v3318_v58 }
 0xa4e   : > { %3182 = vmatprep.subr.bf16.mxu0 %v3461_v9 }
 0xa50   : > { %3171 = vmatmul.mubr.msk.bf16.vlgmr.msra.gmra.mrb[32].mxu0 %vm439_vm0, %v1520_v55 }
 0xa51   : > { %3183 = vmatpush3.bf16.msra.mxu0 %v3319_v59  ;;  %3186 = vmatprep.mubr.msk.bf16.mxu0 %vm3462_vm1, %v3461_v9  ;;  %v3321_v59 = vld [vmem:[%s4066_s4 + $0x10] sm:$0xff]  }
 0xa52   : > { %3184 = vmatprep.subr.bf16.mxu0 %v3461_v9 }
 0xa55   : > { %3185 = vmatpush3.bf16.msra.mxu0 %v3320_v60  ;;  %v3322_v60 = vld [vmem:[%s4066_s4 + $0x18] sm:$0xff]  }
 0xa56   : > { %3200 = vmatprep.subr.mxu0 %v3461_v9 }
 0xa58   : > { %3187 = vmatmul.mubr.msk.bf16.vlgmr.msra.gmra.mrb[36].mxu0 %vm439_vm0, %v1520_v55 }
 0xa59   : > { %3202 = vmatprep.mubr.msk.f32.mxu0 %vm3462_vm1, %v3461_v9 }
 0xb13   : > { %v1638_v62 = vpop.f32.mrb[24].mxu0  ;;  %v1742_v63 = vpop.f32.mrb[24].mxu1 }
 0xb14   : > { %v1743_v1 = vadd.f32 %v2883_v61, %v1742_v63  ;;  %v3148_v3 = vpop.f32.mrb[25].mxu0  ;;  %v3164_v4 = vpop.f32.mrb[25].mxu1  ;;  %v1639_v10 = vadd.f32 %v2881_v0, %v1638_v62 }
 0xb15   : > { %v1641_v5 = vpop.f32.mrb[26].mxu0  ;;  %v1745_v6 = vpop.f32.mrb[26].mxu1 }
 0xb16   : > { %v3149_v7 = vpop.f32.mrb[27].mxu0  ;;  %v3165_v8 = vpop.f32.mrb[27].mxu1  ;;  %3191 = vmatpush3.xpose.msk.msra.mxu1 %vm857_vm2, %v1743_v1 }
 0xb17   : > { %3195 = vmatprep.subr.mxu1 %v3461_v9 }
 0xb19   : > { %3193 = vmatmul.mubr.msk.f32.vlgmr.msra.gmra.mrb[32].mxu1 %vm857_vm2, %v1639_v10 }
 0xb1a   : > { %3197 = vmatprep.mubr.msk.f32.mxu1 %vm3462_vm1, %v3461_v9 }
 0xb1b   : > { %v1690_v12 = vpop.f32.mrb[28].mxu0  ;;  %v1846_v13 = vpop.f32.mrb[28].mxu1 }
 0xb1c   : > { %v1847_v14 = vadd.f32 %v2885_v11, %v1846_v13  ;;  %v3156_v15 = vpop.f32.mrb[29].mxu0  ;;  %v3180_v16 = vpop.f32.mrb[29].mxu1  ;;  %v1691_v29 = vadd.f32 %v2882_v24, %v1690_v12  ;;  %v2920_v12 = vld [vmem:[%s4070_s8 + $0xc] ss:$0 sm:$0xff] }
 0xb1d   : > { %v1693_v17 = vpop.f32.mrb[30].mxu0  ;;  %v1849_v18 = vpop.f32.mrb[30].mxu1 }
 0xb1e   : > { %v3157_v19 = vpop.f32.mrb[31].mxu0  ;;  %v3181_v21 = vpop.f32.mrb[31].mxu1  ;;  %3201 = vmatpush3.msra.mxu0 %v1847_v14 }
 0xb1f   : > { %3210 = vmatprep.subr.bf16.mxu0 %v3461_v9 }
 0xb23   : > { %v1794_v23 = vpop.f32.mrb[32].mxu0 }
 0xb24   : > { %v1795_v25 = vadd.f32 %v2884_v22, %v1794_v23  ;;  %v3172_v26 = vpop.f32.mrb[33].mxu0 }
 0xb25   : > { %v1797_v27 = vpop.f32.mrb[34].mxu0  ;;  %v3323_v26 = vld [vmem:[%s4067_s5 + $0x10] sm:$0xff]  }
 0xb26   : > { %v3173_v28 = vpop.f32.mrb[35].mxu0  ;;  %3196 = vmatpush3.xpose.msk.msra.mxu1 %vm857_vm2, %v1795_v25 }
 0xb27   : > { %3205 = vmatprep.subr.mxu1 %v3461_v9 }
 0xb29   : > { %3198 = vmatmul.mubr.msk.f32.vlgmr.msra.gmra.mrb[34].mxu1 %vm857_vm2, %v1691_v29 }
 0xb2a   : > { %3207 = vmatprep.mubr.msk.f32.mxu1 %vm3462_vm1, %v3461_v9 }
 0xb2b   : > { %v1898_v31 = vpop.f32.mrb[36].mxu0 }
 0xb2c   : > { %v1899_v32 = vadd.f32 %v2886_v30, %v1898_v31  ;;  %v3188_v33 = vpop.f32.mrb[37].mxu0  ;;  %v2923_v31 = vld [vmem:[%s4070_s8 + $0x8] ss:$0 sm:$0xff] }
 0xb2d   : > { %v1901_v34 = vpop.f32.mrb[38].mxu0  ;;  %v2924_v33 = vld [vmem:[%s4070_s8 + $0x9] ss:$0 sm:$0xff] }
 0xb2e   : > { %v3189_v35 = vpop.f32.mrb[39].mxu0  ;;  %3206 = vmatpush3.msra.mxu1 %v1899_v32 }
 0xb2f   : > { %3216 = vmatprep.subr.bf16.mxu1 %v3461_v9 }
 0xbec   : > { %v1976_v36 = vpop.f32.mrb[32].mxu1 }
 0xbed   : > { %v1977_v37 = vadd.f32 %v3705_v2, %v1976_v36  ;;  %v3194_v38 = vpop.f32.mrb[33].mxu1 }
 0xbee   : > { %v3326_v38 = vld [vmem:[%s4069_s7 + $0x28] sm:$0xff]  }
 0xbef   : > { %v2056_v39 = vsel %vm1010_vm3, %v1977_v37, -inf }
 0xbf0   : > { %2057 = vmax.xlane.f32.xlu0 %v2056_v39  ;;  %v3327_v39 = vld [vmem:[%s4069_s7 + $0x30] sm:$0xff]  }
 0xbfc   : > { %v2052_v40 = vpop.f32.mrb[34].mxu1 }
 0xbfd   : > { %v2053_v41 = vadd.f32 %v3705_v2, %v2052_v40  ;;  %v3199_v42 = vpop.f32.mrb[35].mxu1  ;;  %v3328_v40 = vld [vmem:[%s4069_s7 + $0x38] sm:$0xff]  }
 0xbff   : > { %v2059_v43 = vsel %vm1010_vm3, %v2053_v41, -inf }
 0xc00   : > { %2060 = vmax.xlane.f32.xlu1 %v2059_v43 }
 0xc7d   : > { %v2058_v44 = vpop.xlane.xlu0 %2057 }
 0xc7e   : > { %v2062_v45 = vsub.f32 %v1977_v37, %v2058_v44  ;;  %v3325_v37 = vld [vmem:[%s4069_s7 + $0x20] sm:$0xff]  }
 0xc80   : > { %v2064_v46 = vmul.f32 1.442695, %v2062_v45 }
 0xc82   : > { %3351 = vpow2.f32 %v2064_v46 }
 0xc8c   : > { %v3352_v47 = vpop.eup %3351 }
 0xc8d   : > { %v2061_v48 = vpop.xlane.xlu1 %2060  ;;  %v2068_v49 = vsel %vm1010_vm3, %v3352_v47, 0.0 }
 0xc8e   : > { %v2063_v50 = vsub.f32 %v2053_v41, %v2061_v48  ;;  %2069 = vadd.xlane.f32.xlu0 %v2068_v49  ;;  %v2930_v41 = vld [vmem:[%s4068_s6 + $0x1] ss:$0 sm:$0xff] }
 0xc90   : > { %v2066_v51 = vmul.f32 1.442695, %v2063_v50 }
 0xc92   : > { %3353 = vpow2.f32 %v2066_v51 }
 0xc9c   : > { %v3354_v53 = vpop.eup %3353 }
 0xc9d   : > { %v2071_v54 = vsel %vm1010_vm3, %v3354_v53, 0.0 }
 0xc9e   : > { %2072 = vadd.xlane.f32.xlu1 %v2071_v54 }
 0xd1b   : > { %v2070_v2 = vpop.xlane.xlu0 %2069 }
 0xd1c   : > { %3355 = vrcp.f32 %v2070_v2 }
 0xd26   : > { %v3356_v55 = vpop.eup %3355 }
 0xd27   : > { %v2076_v56 = vmul.f32 %v3356_v55, %v3352_v47 }
 0xd29   : > { %3203 = vmatmul.mubr.msk.f32.vlgmr.msra.gmra.mrb[40].mxu0 %vm1010_vm3, %v2076_v56  ;;  %v2943_v56 = vld [vmem:[%s4070_s8 + $0xd] ss:$0 sm:$0xff] }
 0xd2a   : > { %3212 = vmatprep.mubr.msk.bf16.mxu0 %vm3462_vm1, %v3461_v9  ;;  %3211 = vmatpush3.bf16.msra.mxu0 %v3321_v59 }
 0xd2b   : > { %v2073_v57 = vpop.xlane.xlu1 %2072  ;;  %3222 = vmatprep.subr.bf16.mxu0 %v3461_v9 }
 0xd2c   : > { %3357 = vrcp.f32 %v2073_v57 }
 0xd36   : > { %v3358_v20 = vpop.eup %3357 }
 0xd37   : > { %v2077_v58 = vmul.f32 %v3358_v20, %v3354_v53 }
 0xd39   : > { %3208 = vmatmul.mubr.msk.f32.vlgmr.msra.gmra.mrb[36].mxu1 %vm1010_vm3, %v2077_v58 }
 0xd3a   : > { %3218 = vmatprep.mubr.msk.bf16.mxu1 %vm3462_vm1, %v3461_v9  ;;  %3217 = vmatpush3.bf16.msra.mxu1 %v3322_v60 }
 0xd3b   : > { %3230 = vmatprep.subr.bf16.mxu1 %v3461_v9 }
 0xdfc   : > { %v2147_v61 = vpop.f32.mrb[40].mxu0 }
 0xdfd   : > { %v2224_v62 = vpack.c.bf16 %v2147_v61, %v2147_v61  ;;  %v3204_v63 = vpop.f32.mrb[41].mxu0 }
 0xdff   : > { %3213 = vmatmul.mubr.msk.bf16.vlgmr.msra.gmra.mrb[44].mxu0 %vm857_vm2, %v2224_v62 }
 0xe00   : > { %3226 = vmatprep.mubr.msk.bf16.mxu0 %vm3462_vm1, %v3461_v9  ;;  %3223 = vmatpush3.bf16.msra.mxu0 %v3323_v26 }
 0xe01   : > { %3224 = vmatprep.subr.bf16.mxu0 %v3461_v9 }
 0xe0c   : > { %v2220_v0 = vpop.f32.mrb[36].mxu1 }
 0xe0d   : > { %v2225_v1 = vpack.c.bf16 %v2220_v0, %v2220_v0  ;;  %v3209_v3 = vpop.f32.mrb[37].mxu1 }
 0xe0f   : > { %3219 = vmatmul.mubr.msk.bf16.vlgmr.msra.gmra.mrb[40].mxu1 %vm857_vm2, %v2225_v1 }
 0xe10   : > { %3238 = vmatprep.mubr.msk.bf16.mxu1 %vm3462_vm1, %v3461_v9  ;;  %3231 = vmatpush3.bf16.msra.mxu1 %v3325_v37 }
 0xe11   : > { %3232 = vmatprep.subr.bf16.mxu1 %v3461_v9 }
 0xe14   : > { %3233 = vmatpush3.bf16.msra.mxu1 %v3326_v38 }
 0xe15   : > { %3234 = vmatprep.subr.bf16.mxu1 %v3461_v9 }
 0xe18   : > { %3235 = vmatpush3.bf16.msra.mxu1 %v3327_v39 }
 0xe19   : > { %3236 = vmatprep.subr.bf16.mxu1 %v3461_v9 }
 0xe1c   : > { %3237 = vmatpush3.bf16.msra.mxu1 %v3328_v40 }
 0xed2   : > { %v2274_v4 = vpop.f32.mrb[44].mxu0 }
 0xed3   : > { %v3214_v5 = vpop.f32.mrb[45].mxu0  ;;  %v2329_v10 = vsel %vm439_vm0, %v2274_v4, 0.0 }
 0xed4   : > { %v2277_v6 = vpop.f32.mrb[46].mxu0  ;;  %v3331_v5 = vld [vmem:[%s4071_s9 + $0x4] ss:$8 sps:$4 sm:$0xff]  }
 0xed5   : > { %v3215_v7 = vpop.f32.mrb[47].mxu0  ;;  %v3329_v6 = vld [vmem:[%s4071_s9] ss:$8 sps:$4 sm:$0xff]  }
 0xed6   : > { %v3332_v7 = vld [vmem:[%s4071_s9 + $0x10] ss:$8 sps:$4 sm:$0xff]  }
 0xee2   : > { %v2323_v8 = vpop.f32.mrb[40].mxu1 }
 0xee3   : > { %v2330_v11 = vsel %vm439_vm0, %v2323_v8, 0.0  ;;  %v3220_v13 = vpop.f32.mrb[41].mxu1  ;;  %v3334_v8 = vld [vmem:[%s4071_s9 + $0x14] ss:$8 sps:$4 sm:$0xff]  }
 0xee4   : > { %v2331_v14 = vadd.f32 %v2330_v11, %v2329_v10  ;;  %v2326_v15 = vpop.f32.mrb[42].mxu1  ;;  %v3463_v10 = vmov 0  }
 0xee5   : > { %v3221_v16 = vpop.f32.mrb[43].mxu1  ;;  %v2951_v15 = vld [vmem:[%s4070_s8 + $0xa] ss:$0 sm:$0xff] }
 0xee6   : > { %v2340_v17 = vadd.f32 %v2920_v12, %v2331_v14 }
 0xee8   : > { %v2341_v18 = vadd.f32 %v2340_v17, %v3807_v52  ;;  %v3324_v52 = vld [vmem:[%s4067_s5 + $0x18] sm:$0xff]   ;;  %v2952_v17 = vld [vmem:[%s4070_s8 + $0xb] ss:$0 sm:$0xff] }
 0xee9   : > { %3225 = vmatpush3.bf16.msra.mxu0 %v3324_v52 }
 0xeea   : > { %v2346_v19 = vsel %vm439_vm0, %v2341_v18, 0.0  ;;  %2609 = vmatprep.subr.bf16.mxu0 %v3331_v5 }
 0xeeb   : > { %2347 = vadd.xlane.f32.xlu0 %v2346_v19 }
 0xf78   : > { %v2348_v21 = vpop.xlane.xlu0 %2347 }
 0xf79   : > { %v2349_v22 = vmul.f32 0.03125, %v2348_v21 }
 0xf7b   : > { %v2350_v23 = vsub.f32 %v2341_v18, %v2349_v22 }
 0xf7d   : > { %v2351_v24 = vmul.f32 %v2350_v23, %v2350_v23 }
 0xf7f   : > { %v2352_v25 = vsel %vm439_vm0, %v2351_v24, 0.0 }
 0xf80   : > { %2353 = vadd.xlane.f32.xlu1 %v2352_v25 }
0x100d   : > { %v2354_v27 = vpop.xlane.xlu1 %2353 }
0x100e   : > { %v2355_v28 = vmul.f32 0.03125, %v2354_v27 }
0x1010   : > { %v2356_v29 = vadd.f32 1e-12, %v2355_v28 }
0x1012   : > { %3359 = vrsqrt.f32 %v2356_v29 }
0x101c   : > { %v3360_v30 = vpop.eup %3359 }
0x101d   : > { %v2358_v32 = vmul.f32 %v3360_v30, %v2350_v23 }
0x101f   : > { %v2365_v34 = vmul.f32 %v2923_v31, %v2358_v32 }
0x1021   : > { %v2372_v35 = vadd.f32 %v2924_v33, %v2365_v34 }
0x1023   : > { %v2373_v36 = vpack.c.bf16 %v2372_v35, %v2372_v35 }
0x1025   : > { %3227 = vmatmul.mubr.msk.bf16.vlgmr.msra.gmra.mrb[48].mxu0 %vm439_vm0, %v2373_v36 }
0x1026   : > { %2610 = vmatpush1.bf16.msra.mxu0 %v3329_v6  ;;  %2641 = vmatprep.mubr.bf16.mxu0 %v3463_v10 }
0x1027   : > { %2611 = vmatprep.subr.bf16.mxu0 %v3334_v8 }
0x102a   : > { %2612 = vmatpush1.bf16.msra.mxu0 %v3332_v7 }
0x10f8   : > { %v2436_v42 = vpop.f32.mrb[48].mxu0 }
0x10f9   : > { %v2437_v43 = vadd.f32 %v2930_v41, %v2436_v42  ;;  %v3228_v44 = vpop.f32.mrb[49].mxu0 }
0x10fa   : > { %v2439_v45 = vpop.f32.mrb[50].mxu0 }
0x10fb   : > { %v2443_v46 = vmul.f32 0.044715, %v2437_v43  ;;  %v3229_v47 = vpop.f32.mrb[51].mxu0  ;;  %v2442_v54 = vmul.f32 0.5, %v2437_v43 }
0x10fd   : > { %v2444_v48 = vmul.f32 %v2443_v46, %v2437_v43 }
0x10ff   : > { %v2445_v49 = vmul.f32 %v2444_v48, %v2437_v43 }
0x1101   : > { %v2446_v50 = vadd.f32 %v2445_v49, %v2437_v43 }
0x1103   : > { %v2447_v51 = vmul.f32 0.7978846, %v2446_v50 }
0x1105   : > { %3361 = vtanh.f32 %v2447_v51 }
0x110f   : > { %v3362_v53 = vpop.eup %3361 }
0x1110   : > { %v2449_v2 = vadd.f32 1.0, %v3362_v53 }
0x1112   : > { %v2450_v9 = vmul.f32 %v2449_v2, %v2442_v54 }
0x1114   : > { %v2451_v55 = vpack.c.bf16 %v2450_v9, %v2450_v9 }
0x1116   : > { %3239 = vmatmul.mubr.msk.bf16.vlgmr.msra.gmra.mrb[44].mxu1 %vm1444_vm4, %v2451_v55 }
0x11e9   : > { %v2530_v57 = vpop.f32.mrb[44].mxu1 }
0x11ea   : > { %v2531_v20 = vadd.f32 %v2943_v56, %v2530_v57  ;;  %v3240_v58 = vpop.f32.mrb[45].mxu1 }
0x11eb   : > { %v2533_v59 = vpop.f32.mrb[46].mxu1 }
0x11ec   : > { %v3241_v60 = vpop.f32.mrb[47].mxu1  ;;  %v2536_v61 = vadd.f32 %v2531_v20, %v2372_v35 }
0x11ee   : > { %v2541_v62 = vsel %vm439_vm0, %v2536_v61, 0.0 }
0x11ef   : > { %2542 = vadd.xlane.f32.xlu0 %v2541_v62 }
0x127c   : > { %v2543_v63 = vpop.xlane.xlu0 %2542 }
0x127d   : > { %v2544_v0 = vmul.f32 0.03125, %v2543_v63 }
0x127f   : > { %v2545_v1 = vsub.f32 %v2536_v61, %v2544_v0 }
0x1281   : > { %v2546_v3 = vmul.f32 %v2545_v1, %v2545_v1 }
0x1283   : > { %v2547_v4 = vsel %vm439_vm0, %v2546_v3, 0.0 }
0x1284   : > { %2548 = vadd.xlane.f32.xlu1 %v2547_v4 }
0x1311   : > { %v2549_v11 = vpop.xlane.xlu1 %2548 }
0x1312   : > { %v2550_v12 = vmul.f32 0.03125, %v2549_v11 }
0x1314   : > { %v2551_v13 = vadd.f32 1e-12, %v2550_v12 }
0x1316   : > { %3363 = vrsqrt.f32 %v2551_v13 }
0x1320   : > { %v3364_v14 = vpop.eup %3363 }
0x1321   : > { %v2553_v16 = vmul.f32 %v3364_v14, %v2545_v1 }
0x1323   : > { %v2560_v18 = vmul.f32 %v2951_v15, %v2553_v16 }
0x1325   : > { %v2567_v19 = vadd.f32 %v2952_v17, %v2560_v18 }
0x1327   : > { %v2569_v21 = vpack.c.bf16 %v2567_v19, %v2567_v19  ;;  %2568 = vst.msk [vmem:[%s419_s26] sm:$0xff] %vm439_vm0, %v2567_v19 }
0x1329   : > { %2957 = vmatmul.mubr.msk.bf16.vlgmr.msra.gmra.mrb[52].mxu0 %vm439_vm0, %v2569_v21 }
0x132a   : > { %3378 = shalt.err (!%p3375_p3)
}
0x132b   : > { %s3379_s0 = scalar_lea.hbm %s3991_s17, 128  ;;  %s3383_s16 = scalar_lea.hbm %s4073_s11, 256 }
0x132c   : > { %p3380_p4 = scmp.ne.s32.totalorder %s3991_s17, %s3379_s0  ;;  %p3384_p9 = scmp.lt.u32.totalorder %s3991_s17, %s4073_s11 }
0x132d   : > { %p3385_p10 = scmp.lt.u32.totalorder %s3383_s16, %s3379_s0  ;;  %p3387_p12 = scmp.lt.u32.totalorder %s3379_s0, %s3991_s17 }
0x132e   : > { %p3381_p7 = pnand %p3380_p4, %p3569_p5 }
0x132f   : > { %p3386_p11 = por %p3385_p10, %p3384_p9 }
0x1330   : > { %p3382_p8 = pneg %p3381_p7 }
0x1331   : > { %p3388_p13 = por %p3387_p12, %p3386_p11 }
0x1333   : > { %p3389_p0 = pnand %p3388_p13, %p3382_p8 }
0x1335   : > { %3392 = shalt.err (!%p3389_p0)
}
0x1336   : > { %3242 = dma.vmem_to_hbm [thread:$0]  (%p3569_p5), %s2672_s15, 128, %s3991_s17, %s2653_s1   ;;  %v2576_v22 = vlaneseq  ;;  %v2574_v25 = vld [vmem:[%s4072_s10] sm:$0x3] }
0x1337   : > { %s2790_s2 = sshll.u32 %s3976_s29, 4  ;;  %s2965_s0 = sshll.u32 %s3552_s25, 8 }
0x1338   : > { %v2577_v23 = vshrl.u32 %v2576_v22, 7  ;;  %s426_s28 = scalar_lea.vmem [#allocation4], %s2790_s2  ;;  %s4019_s17 = scalar_lea.hbm %s4074_s12, %s2965_s0 }
0x1339   : > { %s2685_s16 = sshll.u32 %s426_s28, 4  ;;  %s2658_s25 = scalar_lea.sflag [#allocation5], %s3976_s29  ;;  %s4021_s16 = int_to_ptr.vmem [resolvable:$true] %s2685_s16 }
0x133a   : > { %v2578_v24 = vsub.s32 0, %v2577_v23  ;;  %v2582_v26 = vsub.s32 1, %v2577_v23  ;;  %s3393_s19 = scalar_lea.vmem %s4021_s16, 256  ;;  %s3465_s18 = smov [#allocation4]  }
0x133b   : > { %p3394_p1 = scmp.ne.s32.totalorder %s4021_s16, %s3393_s19  ;;  %s3397_s2 = sshll.u32 %s3465_s18, 4  ;;  %s3398_s2 = int_to_ptr.vmem [resolvable:$false] %s3397_s2 }
0x133c   : > { %v2579_v52 = vrot.slane %v2574_v25, %v2578_v24  ;;  %v2583_v27 = vrot.slane %v2574_v25, %v2582_v26  ;;  %s3399_s20 = scalar_lea.vmem %s3398_s2, 512  ;;  %p3400_p4 = scmp.lt.s32.totalorder %s4021_s16, %s3398_s2 }
0x133d   : > { %p3395_p2 = pnand %p3394_p1, %p3569_p5  ;;  %p3401_p7 = scmp.lt.s32.totalorder %s3399_s20, %s3393_s19 }
0x133f   : > { %p3396_p3 = pneg %p3395_p2  ;;  %p3402_p8 = por %p3401_p7, %p3400_p4 }
0x1341   : > { %p3403_p9 = pnand %p3402_p8, %p3396_p3 }
0x13fc   : > { %v2643_v28 = vpop.f32.mrb[52].mxu0 }
0x13fd   : > { %v2644_v29 = vadd.f32 %v2643_v28, %v2579_v52  ;;  %v2645_v30 = vpop.f32.mrb[53].mxu0 }
0x13fe   : > { %v2646_v31 = vadd.f32 %v2645_v30, %v2583_v27  ;;  %v2647_v32 = vpop.f32.mrb[54].mxu0 }
0x13ff   : > { %2650 = vst [vmem:[%s426_s28] sm:$0xff] %v2644_v29  ;;  %v2648_v33 = vpop.f32.mrb[55].mxu0 }
0x1400   : > { %2651 = vst [vmem:[%s426_s28 + $0x8] sm:$0xff] %v2646_v31 }
0x1401   : > { %3406 = shalt.err (!%p3403_p9)
}
0x1402   : > { %s3407_s29 = scalar_lea.hbm %s4019_s17, 256  ;;  %s3411_s28 = scalar_lea.hbm %s4074_s12, 512 }
0x1403   : > { %p3408_p10 = scmp.ne.s32.totalorder %s4019_s17, %s3407_s29  ;;  %p3412_p13 = scmp.lt.u32.totalorder %s4019_s17, %s4074_s12 }
0x1404   : > { %p3413_p0 = scmp.lt.u32.totalorder %s3411_s28, %s3407_s29  ;;  %p3415_p2 = scmp.lt.u32.totalorder %s3407_s29, %s4019_s17 }
0x1405   : > { %p3409_p11 = pnand %p3408_p10, %p3569_p5 }
0x1406   : > { %p3414_p1 = por %p3413_p0, %p3412_p13 }
0x1407   : > { %p3410_p12 = pneg %p3409_p11 }
0x1408   : > { %p3416_p3 = por %p3415_p2, %p3414_p1 }
0x140a   : > { %p3417_p4 = pnand %p3416_p3, %p3410_p12 }
0x140c   : > { %3420 = shalt.err (!%p3417_p4)
}
0x140d   : > { %3243 = dma.vmem_to_hbm [thread:$0]  (%p3569_p5), %s4021_s16, 256, %s4019_s17, %s2658_s25  }
0x140e PF: > { %p3253_p7 = scmp.ge.s32.totalorder %s3459_s24, 2  ;;  %s2697_s19 = sand.u32 1, %s3447_s21  }
0x140f   : > { %s2698_s18 = scalar_lea.sflag [#allocation3], %s2697_s19 }
0x1410   : > { %p3247_p8 = pnand %p3253_p7, %p3573_p6 }
0x1412   : > { %3438 = dma.done.wait (!%p3247_p8), %s2698_s18, 128  }
0x1413   : > { %3440 = vsyncadd (!%p3247_p8), %s2698_s18, 4294967168  ;;  %s2707_s2 = scalar_lea.sflag [#allocation5], %s2697_s19 }
0x1414   : > { %3442 = dma.done.wait (!%p3247_p8), %s2707_s2, 256  }
0x1415   : > { %3444 = vsyncadd (!%p3247_p8), %s2707_s2, 4294967040  ;;  %p26_p5 = scmp.ge.s32.totalorder %s3556_s27, 4   ;;  %s4083_s21 = smov %s3451_s22 }
0x1416   : > { %s4084_s22 = smov %s3455_s23  ;;  %s4085_s23 = smov %s3567_s30 }
0x1417   : > { %s4086_s24 = smov %s3556_s27  ;;  %28 = sbr.rel (!%p26_p5) target bundleno = 9 (0x9), region = 138 }
0x141e   :  { %2712 = vsyncpa [#allocation3], 1 }
0x141f   :  { %2714 = vsyncpa [#allocation3 + $0x1], 1 }
0x1420   :  { %2715 = vsyncpa [#allocation5], 1 }
0x1421   :  { %2717 = vsyncpa [#allocation5 + $0x1], 1 }

</bundles_post_ra>
